<compile_context>
chip_gen: v7x
topology: tpu7x:2x2x1
jax: 0.10.0
libtpu: 0.0.40
codegen_flags: <defaults>
</compile_context>

<pallas_src>
import functools

import numpy as np
import jax
import jax.numpy as jnp
from jax import lax
from jax.experimental import pallas as pl
from jax.experimental.pallas import tpu as pltpu

# OGB bond feature dims: bond type, bond stereo, is_conjugated.
FULL_BOND_FEATURE_DIMS = (5, 6, 2)
F_TOTAL = sum(FULL_BOND_FEATURE_DIMS)
_GROUP_OFFSETS = tuple(
    sum(FULL_BOND_FEATURE_DIMS[:i]) for i in range(len(FULL_BOND_FEATURE_DIMS)))

_IN_OUT_VMEM_BUDGET = 16 * 1024 * 1024   # double-buffered in+out block budget


def _round_up8(n):
    return ((n + 7) // 8) * 8


def _choose_pack(emb_dim, num_edges, max_pack=8):
    """Largest p <= max_pack with lane-dense output ((p*emb_dim)%128==0), packed
    features fitting one vreg lane group (p*F_TOTAL<=128) and p | num_edges so
    the packed reshape is a free row-major view (no pad / slice HBM passes)."""
    best = 1
    for p in range(1, max_pack + 1):
        if p * F_TOTAL > 128 or num_edges % p:
            continue
        if (p * emb_dim) % 128 == 0:
            best = p
    return best


def _argmax_embed_kernel(x_ref, u_ref, w_ref, o_ref, *, groups):
    """Exact first-max argmax + embedding sum.

    x_ref: [TR, PF] f32  packed edge features (pack edges folded into lanes)
    u_ref: [PF, PF] f32  constant "same group & j<=l" block-triangular matrix
    w_ref: [PF, PN] f32  block-diagonal stacked embedding tables
    o_ref: [TR, PN] f32  packed output embeddings
    groups: static tuple of (lane_offset, width); disjoint, covering all lanes.
    """
    x = x_ref[...]
    tr, pf = x.shape
    lane = lax.broadcasted_iota(jnp.int32, (1, pf), 1)

    # Per group: ONE masked cross-lane max (XLU) + equality mask (VPU).
    is_max = jnp.zeros((tr, pf), jnp.float32)
    for off, width in groups:                                   # static, unrolled
        in_grp = (lane >= off) & (lane < off + width)
        vals = jnp.where(in_grp, x, -jnp.inf)
        m = jnp.max(vals, axis=1, keepdims=True)                # (tr, 1)
        is_max = jnp.where(in_grp & (x == m), 1.0, is_max)      # disjoint groups

    # First-occurrence tie-break on the MXU: segmented inclusive prefix count
    # of the maxima; the winner of each group is the unique lane with count 1.
    # (0/1 operands -> exact even at default matmul precision.)
    cnt = jnp.dot(is_max, u_ref[...], preferred_element_type=jnp.float32)
    onehot = jnp.where(cnt == 1.0, is_max, 0.0)

    # Embedding lookup + per-group sum as one fused block-diagonal matmul.
    o_ref[...] = jnp.dot(onehot, w_ref[...],
                         precision=lax.Precision.HIGHEST,
                         preferred_element_type=jnp.float32).astype(o_ref.dtype)


def _onehot_embed_kernel(x_ref, w_ref, o_ref):
    """Fast path for strictly one-hot edge_attr: lookup + sum == one matmul."""
    o_ref[...] = jnp.dot(x_ref[...], w_ref[...],
                         precision=lax.Precision.HIGHEST,
                         preferred_element_type=jnp.float32).astype(o_ref.dtype)


@functools.partial(jax.jit, static_argnames=("tile_e", "one_hot_input"))
def bond_encoder(edge_attr, w_cat, *, tile_e=16384, one_hot_input=False):
    """edge_attr: [E, F_TOTAL] f32 concatenated (one-hot) feature blocks.
       w_cat:     [F_TOTAL, emb_dim] f32 per-group embedding tables stacked row-wise.
       Returns [E, emb_dim] f32, same as the PyTorch BondEncoder forward.
       one_hot_input=True skips the in-kernel argmax (exact for OGB inputs,
       which are one-hot by construction) and runs a pure matmul kernel."""
    E, F = edge_attr.shape
    assert F == F_TOTAL
    emb_dim = w_cat.shape[1]

    # Fold `pack` edges into lanes (free row-major view) -> lane-dense blocks.
    # TODO(synk): guarantee pack-aligned E upstream so awkward E also gets the
    # dense pack=8 layout instead of falling back to pack=1.
    pack = _choose_pack(emb_dim, E)
    rows = E // pack
    PF = pack * F
    PN = pack * emb_dim

    x_packed = edge_attr.reshape(rows, PF)                      # no copy
    w_bd = jnp.kron(jnp.eye(pack, dtype=w_cat.dtype), w_cat)    # [PF, PN] block-diag

    groups = tuple((p * F + off, d)
                   for p in range(pack)
                   for off, d in zip(_GROUP_OFFSETS, FULL_BOND_FEATURE_DIMS))

    # Row tile: large (amortize ~0.35us/grid-step), multiple of 8 sublanes,
    # VMEM-budget capped, split so the grid has >=2 blocks (both v7x TCs busy).
    tile_r = max(8, (max(8, tile_e // pack) // 8) * 8)
    vmem_cap = max(8, (_IN_OUT_VMEM_BUDGET // (4 * (PF + PN) * 2) // 8) * 8)
    tile_r = min(tile_r, vmem_cap)
    if rows > 8:
        tile_r = min(tile_r, _round_up8(pl.cdiv(rows, 2)))
    else:
        tile_r = rows
    grid = (pl.cdiv(rows, tile_r),)

    x_spec = pl.BlockSpec((tile_r, PF), lambda i: (i, 0))
    w_spec = pl.BlockSpec((PF, PN), lambda i: (0, 0))            # resident table
    out_spec = pl.BlockSpec((tile_r, PN), lambda i: (i, 0))
    params = pltpu.CompilerParams(
        dimension_semantics=("parallel",),
        vmem_limit_bytes=32 * 1024 * 1024)

    if one_hot_input:
        out = pl.pallas_call(
            _onehot_embed_kernel,
            out_shape=jax.ShapeDtypeStruct((rows, PN), jnp.float32),
            grid_spec=pltpu.PrefetchScalarGridSpec(
                num_scalar_prefetch=0, grid=grid,
                in_specs=[x_spec, w_spec], out_specs=out_spec),
            compiler_params=params,
        )(x_packed, w_bd)
    else:
        # Constant [PF, PF] "same group & j <= l" matrix for the segmented
        # prefix count (first-max tie-break) on the MXU.
        u_np = np.zeros((PF, PF), np.float32)
        for off, width in groups:
            for a in range(width):
                u_np[off + a, off + a:off + width] = 1.0
        u = jnp.asarray(u_np)
        u_spec = pl.BlockSpec((PF, PF), lambda i: (0, 0))        # resident

        out = pl.pallas_call(
            functools.partial(_argmax_embed_kernel, groups=groups),
            out_shape=jax.ShapeDtypeStruct((rows, PN), jnp.float32),
            grid_spec=pltpu.PrefetchScalarGridSpec(
                num_scalar_prefetch=0, grid=grid,
                in_specs=[x_spec, u_spec, w_spec], out_specs=out_spec),
            compiler_params=params,
        )(x_packed, u, w_bd)

    return out.reshape(E, emb_dim)                               # no copy


def xavier_uniform(key, shape):
    fan_in, fan_out = shape[0], shape[1]
    bound = (6.0 / (fan_in + fan_out)) ** 0.5
    return jax.random.uniform(key, shape, jnp.float32, -bound, bound)


def reference_bond_encoder(edge_attr, tables):
    """Plain-JAX reference mirroring the PyTorch forward."""
    out = 0
    start = 0
    for i, dim in enumerate(FULL_BOND_FEATURE_DIMS):
        feat = edge_attr[:, start:start + dim]
        idx = jnp.argmax(feat, axis=1)
        out = out + tables[i][idx]
        start += dim
    return out


if __name__ == "__main__":
    key = jax.random.PRNGKey(0)
    EMB_DIM = 32

    k_tabs, k_idx = jax.random.split(key)
    tab_keys = jax.random.split(k_tabs, len(FULL_BOND_FEATURE_DIMS))
    tables = [xavier_uniform(k, (d, EMB_DIM))
              for k, d in zip(tab_keys, FULL_BOND_FEATURE_DIMS)]
    w_cat = jnp.concatenate(tables, axis=0)           # [F_TOTAL, EMB_DIM]

    def make_edge_attr(k, num_edges):
        idx_keys = jax.random.split(k, len(FULL_BOND_FEATURE_DIMS))
        blocks = []
        for kk, d in zip(idx_keys, FULL_BOND_FEATURE_DIMS):
            ids = jax.random.randint(kk, (num_edges,), 0, d)
            blocks.append(jax.nn.one_hot(ids, d, dtype=jnp.float32))
        return jnp.concatenate(blocks, axis=1)        # [num_edges, F_TOTAL]

    # Case 1: pack=8 lane-dense layout, exact argmax path, 2-block grid.
    E1 = 128
    ea1 = make_edge_attr(k_idx, E1)
    out1 = jax.block_until_ready(bond_encoder(ea1, w_cat))
    ref1 = reference_bond_encoder(ea1, tables)
    assert out1.shape == (E1, EMB_DIM)
    assert jnp.allclose(out1, ref1, atol=1e-5, rtol=1e-5)

    # Case 2: ragged E (pack=1 fallback, cdiv grid with a partial tail block).
    E2 = 77
    ea2 = make_edge_attr(jax.random.fold_in(k_idx, 1), E2)
    out2 = jax.block_until_ready(bond_encoder(ea2, w_cat, tile_e=32))
    ref2 = reference_bond_encoder(ea2, tables)
    assert out2.shape == (E2, EMB_DIM)
    assert jnp.allclose(out2, ref2, atol=1e-5, rtol=1e-5)

    # Case 3: one-hot fast path (pure matmul kernel) matches the reference.
    out3 = jax.block_until_ready(bond_encoder(ea1, w_cat, one_hot_input=True))
    assert jnp.allclose(out3, ref1, atol=1e-5, rtol=1e-5)

    # Case 4: non-one-hot floats with ties -> exercises exact first-max argmax.
    ea4 = jnp.round(jax.random.uniform(jax.random.fold_in(k_idx, 2),
                                       (64, F_TOTAL)) * 4.0) / 4.0
    out4 = jax.block_until_ready(bond_encoder(ea4, w_cat))
    ref4 = reference_bond_encoder(ea4, tables)
    assert jnp.allclose(out4, ref4, atol=1e-5, rtol=1e-5)

    print("KERNEL_OK")
</pallas_src>

<mosaic_0001>
module attributes {stable_mosaic.version = 11 : i64} {
  func.func @_argmax_embed_kernel(%arg0: i32, %arg1: memref<8x104xf32, #tpu.memory_space<vmem>>, %arg2: memref<104x104xf32, #tpu.memory_space<vmem>>, %arg3: memref<104x256xf32, #tpu.memory_space<vmem>>, %arg4: memref<8x256xf32, #tpu.memory_space<vmem>>) attributes {dimension_semantics = [#tpu.dimension_semantics<parallel>], iteration_bounds = array<i64: 2>, scalar_prefetch = 0 : i64, scratch_operands = 0 : i64, tpu.core_type = #tpu.core_type<tc>, window_params = [{transform_indices = @transform_0, window_bounds = array<i64: 8, 104>}, {pipeline_mode = #tpu.pipeline_mode<synchronous>, transform_indices = @transform_1, window_bounds = array<i64: 104, 104>}, {pipeline_mode = #tpu.pipeline_mode<synchronous>, transform_indices = @transform_2, window_bounds = array<i64: 104, 256>}, {transform_indices = @transform_3, window_bounds = array<i64: 8, 256>}]} {
    %c0 = arith.constant 0 : index
    %c0_0 = arith.constant 0 : index
    %0 = vector.load %arg1[%c0, %c0_0] : memref<8x104xf32, #tpu.memory_space<vmem>>, vector<8x104xf32>
    %1 = tpu.iota {dimensions = array<i32: 1>} : vector<1x104xi32>
    %cst = arith.constant 0.000000e+00 : f32
    %2 = vector.broadcast %cst : f32 to vector<8x104xf32>
    %c0_i32 = arith.constant 0 : i32
    %3 = vector.broadcast %c0_i32 : i32 to vector<1x104xi32>
    %4 = arith.cmpi sge, %1, %3 : vector<1x104xi32>
    %c5_i32 = arith.constant 5 : i32
    %5 = vector.broadcast %c5_i32 : i32 to vector<1x104xi32>
    %6 = arith.cmpi slt, %1, %5 : vector<1x104xi32>
    %7 = arith.andi %4, %6 : vector<1x104xi1>
    %cst_1 = arith.constant 0xFF800000 : f32
    %8 = vector.shape_cast %7 : vector<1x104xi1> to vector<1x104xi1>
    %9 = vector.broadcast %8 : vector<1x104xi1> to vector<8x104xi1>
    %10 = vector.broadcast %cst_1 : f32 to vector<8x104xf32>
    %11 = arith.select %9, %0, %10 : vector<8x104xi1>, vector<8x104xf32>
    %cst_2 = arith.constant dense<0xFF800000> : vector<8xf32>
    %12 = vector.multi_reduction <maximumf>, %11, %cst_2 [1] : vector<8x104xf32> to vector<8xf32>
    %13 = vector.shape_cast %12 : vector<8xf32> to vector<8x1xf32>
    %14 = vector.broadcast %13 : vector<8x1xf32> to vector<8x104xf32>
    %15 = arith.cmpf oeq, %0, %14 : vector<8x104xf32>
    %16 = vector.broadcast %7 : vector<1x104xi1> to vector<8x104xi1>
    %17 = arith.andi %16, %15 : vector<8x104xi1>
    %cst_3 = arith.constant 1.000000e+00 : f32
    %18 = vector.broadcast %cst_3 : f32 to vector<8x104xf32>
    %19 = arith.select %17, %18, %2 : vector<8x104xi1>, vector<8x104xf32>
    %c5_i32_4 = arith.constant 5 : i32
    %20 = vector.broadcast %c5_i32_4 : i32 to vector<1x104xi32>
    %21 = arith.cmpi sge, %1, %20 : vector<1x104xi32>
    %c11_i32 = arith.constant 11 : i32
    %22 = vector.broadcast %c11_i32 : i32 to vector<1x104xi32>
    %23 = arith.cmpi slt, %1, %22 : vector<1x104xi32>
    %24 = arith.andi %21, %23 : vector<1x104xi1>
    %cst_5 = arith.constant 0xFF800000 : f32
    %25 = vector.shape_cast %24 : vector<1x104xi1> to vector<1x104xi1>
    %26 = vector.broadcast %25 : vector<1x104xi1> to vector<8x104xi1>
    %27 = vector.broadcast %cst_5 : f32 to vector<8x104xf32>
    %28 = arith.select %26, %0, %27 : vector<8x104xi1>, vector<8x104xf32>
    %cst_6 = arith.constant dense<0xFF800000> : vector<8xf32>
    %29 = vector.multi_reduction <maximumf>, %28, %cst_6 [1] : vector<8x104xf32> to vector<8xf32>
    %30 = vector.shape_cast %29 : vector<8xf32> to vector<8x1xf32>
    %31 = vector.broadcast %30 : vector<8x1xf32> to vector<8x104xf32>
    %32 = arith.cmpf oeq, %0, %31 : vector<8x104xf32>
    %33 = vector.broadcast %24 : vector<1x104xi1> to vector<8x104xi1>
    %34 = arith.andi %33, %32 : vector<8x104xi1>
    %cst_7 = arith.constant 1.000000e+00 : f32
    %35 = vector.broadcast %cst_7 : f32 to vector<8x104xf32>
    %36 = arith.select %34, %35, %19 : vector<8x104xi1>, vector<8x104xf32>
    %c11_i32_8 = arith.constant 11 : i32
    %37 = vector.broadcast %c11_i32_8 : i32 to vector<1x104xi32>
    %38 = arith.cmpi sge, %1, %37 : vector<1x104xi32>
    %c13_i32 = arith.constant 13 : i32
    %39 = vector.broadcast %c13_i32 : i32 to vector<1x104xi32>
    %40 = arith.cmpi slt, %1, %39 : vector<1x104xi32>
    %41 = arith.andi %38, %40 : vector<1x104xi1>
    %cst_9 = arith.constant 0xFF800000 : f32
    %42 = vector.shape_cast %41 : vector<1x104xi1> to vector<1x104xi1>
    %43 = vector.broadcast %42 : vector<1x104xi1> to vector<8x104xi1>
    %44 = vector.broadcast %cst_9 : f32 to vector<8x104xf32>
    %45 = arith.select %43, %0, %44 : vector<8x104xi1>, vector<8x104xf32>
    %cst_10 = arith.constant dense<0xFF800000> : vector<8xf32>
    %46 = vector.multi_reduction <maximumf>, %45, %cst_10 [1] : vector<8x104xf32> to vector<8xf32>
    %47 = vector.shape_cast %46 : vector<8xf32> to vector<8x1xf32>
    %48 = vector.broadcast %47 : vector<8x1xf32> to vector<8x104xf32>
    %49 = arith.cmpf oeq, %0, %48 : vector<8x104xf32>
    %50 = vector.broadcast %41 : vector<1x104xi1> to vector<8x104xi1>
    %51 = arith.andi %50, %49 : vector<8x104xi1>
    %cst_11 = arith.constant 1.000000e+00 : f32
    %52 = vector.broadcast %cst_11 : f32 to vector<8x104xf32>
    %53 = arith.select %51, %52, %36 : vector<8x104xi1>, vector<8x104xf32>
    %c13_i32_12 = arith.constant 13 : i32
    %54 = vector.broadcast %c13_i32_12 : i32 to vector<1x104xi32>
    %55 = arith.cmpi sge, %1, %54 : vector<1x104xi32>
    %c18_i32 = arith.constant 18 : i32
    %56 = vector.broadcast %c18_i32 : i32 to vector<1x104xi32>
    %57 = arith.cmpi slt, %1, %56 : vector<1x104xi32>
    %58 = arith.andi %55, %57 : vector<1x104xi1>
    %cst_13 = arith.constant 0xFF800000 : f32
    %59 = vector.shape_cast %58 : vector<1x104xi1> to vector<1x104xi1>
    %60 = vector.broadcast %59 : vector<1x104xi1> to vector<8x104xi1>
    %61 = vector.broadcast %cst_13 : f32 to vector<8x104xf32>
    %62 = arith.select %60, %0, %61 : vector<8x104xi1>, vector<8x104xf32>
    %cst_14 = arith.constant dense<0xFF800000> : vector<8xf32>
    %63 = vector.multi_reduction <maximumf>, %62, %cst_14 [1] : vector<8x104xf32> to vector<8xf32>
    %64 = vector.shape_cast %63 : vector<8xf32> to vector<8x1xf32>
    %65 = vector.broadcast %64 : vector<8x1xf32> to vector<8x104xf32>
    %66 = arith.cmpf oeq, %0, %65 : vector<8x104xf32>
    %67 = vector.broadcast %58 : vector<1x104xi1> to vector<8x104xi1>
    %68 = arith.andi %67, %66 : vector<8x104xi1>
    %cst_15 = arith.constant 1.000000e+00 : f32
    %69 = vector.broadcast %cst_15 : f32 to vector<8x104xf32>
    %70 = arith.select %68, %69, %53 : vector<8x104xi1>, vector<8x104xf32>
    %c18_i32_16 = arith.constant 18 : i32
    %71 = vector.broadcast %c18_i32_16 : i32 to vector<1x104xi32>
    %72 = arith.cmpi sge, %1, %71 : vector<1x104xi32>
    %c24_i32 = arith.constant 24 : i32
    %73 = vector.broadcast %c24_i32 : i32 to vector<1x104xi32>
    %74 = arith.cmpi slt, %1, %73 : vector<1x104xi32>
    %75 = arith.andi %72, %74 : vector<1x104xi1>
    %cst_17 = arith.constant 0xFF800000 : f32
    %76 = vector.shape_cast %75 : vector<1x104xi1> to vector<1x104xi1>
    %77 = vector.broadcast %76 : vector<1x104xi1> to vector<8x104xi1>
    %78 = vector.broadcast %cst_17 : f32 to vector<8x104xf32>
    %79 = arith.select %77, %0, %78 : vector<8x104xi1>, vector<8x104xf32>
    %cst_18 = arith.constant dense<0xFF800000> : vector<8xf32>
    %80 = vector.multi_reduction <maximumf>, %79, %cst_18 [1] : vector<8x104xf32> to vector<8xf32>
    %81 = vector.shape_cast %80 : vector<8xf32> to vector<8x1xf32>
    %82 = vector.broadcast %81 : vector<8x1xf32> to vector<8x104xf32>
    %83 = arith.cmpf oeq, %0, %82 : vector<8x104xf32>
    %84 = vector.broadcast %75 : vector<1x104xi1> to vector<8x104xi1>
    %85 = arith.andi %84, %83 : vector<8x104xi1>
    %cst_19 = arith.constant 1.000000e+00 : f32
    %86 = vector.broadcast %cst_19 : f32 to vector<8x104xf32>
    %87 = arith.select %85, %86, %70 : vector<8x104xi1>, vector<8x104xf32>
    %c24_i32_20 = arith.constant 24 : i32
    %88 = vector.broadcast %c24_i32_20 : i32 to vector<1x104xi32>
    %89 = arith.cmpi sge, %1, %88 : vector<1x104xi32>
    %c26_i32 = arith.constant 26 : i32
    %90 = vector.broadcast %c26_i32 : i32 to vector<1x104xi32>
    %91 = arith.cmpi slt, %1, %90 : vector<1x104xi32>
    %92 = arith.andi %89, %91 : vector<1x104xi1>
    %cst_21 = arith.constant 0xFF800000 : f32
    %93 = vector.shape_cast %92 : vector<1x104xi1> to vector<1x104xi1>
    %94 = vector.broadcast %93 : vector<1x104xi1> to vector<8x104xi1>
    %95 = vector.broadcast %cst_21 : f32 to vector<8x104xf32>
    %96 = arith.select %94, %0, %95 : vector<8x104xi1>, vector<8x104xf32>
    %cst_22 = arith.constant dense<0xFF800000> : vector<8xf32>
    %97 = vector.multi_reduction <maximumf>, %96, %cst_22 [1] : vector<8x104xf32> to vector<8xf32>
    %98 = vector.shape_cast %97 : vector<8xf32> to vector<8x1xf32>
    %99 = vector.broadcast %98 : vector<8x1xf32> to vector<8x104xf32>
    %100 = arith.cmpf oeq, %0, %99 : vector<8x104xf32>
    %101 = vector.broadcast %92 : vector<1x104xi1> to vector<8x104xi1>
    %102 = arith.andi %101, %100 : vector<8x104xi1>
    %cst_23 = arith.constant 1.000000e+00 : f32
    %103 = vector.broadcast %cst_23 : f32 to vector<8x104xf32>
    %104 = arith.select %102, %103, %87 : vector<8x104xi1>, vector<8x104xf32>
    %c26_i32_24 = arith.constant 26 : i32
    %105 = vector.broadcast %c26_i32_24 : i32 to vector<1x104xi32>
    %106 = arith.cmpi sge, %1, %105 : vector<1x104xi32>
    %c31_i32 = arith.constant 31 : i32
    %107 = vector.broadcast %c31_i32 : i32 to vector<1x104xi32>
    %108 = arith.cmpi slt, %1, %107 : vector<1x104xi32>
    %109 = arith.andi %106, %108 : vector<1x104xi1>
    %cst_25 = arith.constant 0xFF800000 : f32
    %110 = vector.shape_cast %109 : vector<1x104xi1> to vector<1x104xi1>
    %111 = vector.broadcast %110 : vector<1x104xi1> to vector<8x104xi1>
    %112 = vector.broadcast %cst_25 : f32 to vector<8x104xf32>
    %113 = arith.select %111, %0, %112 : vector<8x104xi1>, vector<8x104xf32>
    %cst_26 = arith.constant dense<0xFF800000> : vector<8xf32>
    %114 = vector.multi_reduction <maximumf>, %113, %cst_26 [1] : vector<8x104xf32> to vector<8xf32>
    %115 = vector.shape_cast %114 : vector<8xf32> to vector<8x1xf32>
    %116 = vector.broadcast %115 : vector<8x1xf32> to vector<8x104xf32>
    %117 = arith.cmpf oeq, %0, %116 : vector<8x104xf32>
    %118 = vector.broadcast %109 : vector<1x104xi1> to vector<8x104xi1>
    %119 = arith.andi %118, %117 : vector<8x104xi1>
    %cst_27 = arith.constant 1.000000e+00 : f32
    %120 = vector.broadcast %cst_27 : f32 to vector<8x104xf32>
    %121 = arith.select %119, %120, %104 : vector<8x104xi1>, vector<8x104xf32>
    %c31_i32_28 = arith.constant 31 : i32
    %122 = vector.broadcast %c31_i32_28 : i32 to vector<1x104xi32>
    %123 = arith.cmpi sge, %1, %122 : vector<1x104xi32>
    %c37_i32 = arith.constant 37 : i32
    %124 = vector.broadcast %c37_i32 : i32 to vector<1x104xi32>
    %125 = arith.cmpi slt, %1, %124 : vector<1x104xi32>
    %126 = arith.andi %123, %125 : vector<1x104xi1>
    %cst_29 = arith.constant 0xFF800000 : f32
    %127 = vector.shape_cast %126 : vector<1x104xi1> to vector<1x104xi1>
    %128 = vector.broadcast %127 : vector<1x104xi1> to vector<8x104xi1>
    %129 = vector.broadcast %cst_29 : f32 to vector<8x104xf32>
    %130 = arith.select %128, %0, %129 : vector<8x104xi1>, vector<8x104xf32>
    %cst_30 = arith.constant dense<0xFF800000> : vector<8xf32>
    %131 = vector.multi_reduction <maximumf>, %130, %cst_30 [1] : vector<8x104xf32> to vector<8xf32>
    %132 = vector.shape_cast %131 : vector<8xf32> to vector<8x1xf32>
    %133 = vector.broadcast %132 : vector<8x1xf32> to vector<8x104xf32>
    %134 = arith.cmpf oeq, %0, %133 : vector<8x104xf32>
    %135 = vector.broadcast %126 : vector<1x104xi1> to vector<8x104xi1>
    %136 = arith.andi %135, %134 : vector<8x104xi1>
    %cst_31 = arith.constant 1.000000e+00 : f32
    %137 = vector.broadcast %cst_31 : f32 to vector<8x104xf32>
    %138 = arith.select %136, %137, %121 : vector<8x104xi1>, vector<8x104xf32>
    %c37_i32_32 = arith.constant 37 : i32
    %139 = vector.broadcast %c37_i32_32 : i32 to vector<1x104xi32>
    %140 = arith.cmpi sge, %1, %139 : vector<1x104xi32>
    %c39_i32 = arith.constant 39 : i32
    %141 = vector.broadcast %c39_i32 : i32 to vector<1x104xi32>
    %142 = arith.cmpi slt, %1, %141 : vector<1x104xi32>
    %143 = arith.andi %140, %142 : vector<1x104xi1>
    %cst_33 = arith.constant 0xFF800000 : f32
    %144 = vector.shape_cast %143 : vector<1x104xi1> to vector<1x104xi1>
    %145 = vector.broadcast %144 : vector<1x104xi1> to vector<8x104xi1>
    %146 = vector.broadcast %cst_33 : f32 to vector<8x104xf32>
    %147 = arith.select %145, %0, %146 : vector<8x104xi1>, vector<8x104xf32>
    %cst_34 = arith.constant dense<0xFF800000> : vector<8xf32>
    %148 = vector.multi_reduction <maximumf>, %147, %cst_34 [1] : vector<8x104xf32> to vector<8xf32>
    %149 = vector.shape_cast %148 : vector<8xf32> to vector<8x1xf32>
    %150 = vector.broadcast %149 : vector<8x1xf32> to vector<8x104xf32>
    %151 = arith.cmpf oeq, %0, %150 : vector<8x104xf32>
    %152 = vector.broadcast %143 : vector<1x104xi1> to vector<8x104xi1>
    %153 = arith.andi %152, %151 : vector<8x104xi1>
    %cst_35 = arith.constant 1.000000e+00 : f32
    %154 = vector.broadcast %cst_35 : f32 to vector<8x104xf32>
    %155 = arith.select %153, %154, %138 : vector<8x104xi1>, vector<8x104xf32>
    %c39_i32_36 = arith.constant 39 : i32
    %156 = vector.broadcast %c39_i32_36 : i32 to vector<1x104xi32>
    %157 = arith.cmpi sge, %1, %156 : vector<1x104xi32>
    %c44_i32 = arith.constant 44 : i32
    %158 = vector.broadcast %c44_i32 : i32 to vector<1x104xi32>
    %159 = arith.cmpi slt, %1, %158 : vector<1x104xi32>
    %160 = arith.andi %157, %159 : vector<1x104xi1>
    %cst_37 = arith.constant 0xFF800000 : f32
    %161 = vector.shape_cast %160 : vector<1x104xi1> to vector<1x104xi1>
    %162 = vector.broadcast %161 : vector<1x104xi1> to vector<8x104xi1>
    %163 = vector.broadcast %cst_37 : f32 to vector<8x104xf32>
    %164 = arith.select %162, %0, %163 : vector<8x104xi1>, vector<8x104xf32>
    %cst_38 = arith.constant dense<0xFF800000> : vector<8xf32>
    %165 = vector.multi_reduction <maximumf>, %164, %cst_38 [1] : vector<8x104xf32> to vector<8xf32>
    %166 = vector.shape_cast %165 : vector<8xf32> to vector<8x1xf32>
    %167 = vector.broadcast %166 : vector<8x1xf32> to vector<8x104xf32>
    %168 = arith.cmpf oeq, %0, %167 : vector<8x104xf32>
    %169 = vector.broadcast %160 : vector<1x104xi1> to vector<8x104xi1>
    %170 = arith.andi %169, %168 : vector<8x104xi1>
    %cst_39 = arith.constant 1.000000e+00 : f32
    %171 = vector.broadcast %cst_39 : f32 to vector<8x104xf32>
    %172 = arith.select %170, %171, %155 : vector<8x104xi1>, vector<8x104xf32>
    %c44_i32_40 = arith.constant 44 : i32
    %173 = vector.broadcast %c44_i32_40 : i32 to vector<1x104xi32>
    %174 = arith.cmpi sge, %1, %173 : vector<1x104xi32>
    %c50_i32 = arith.constant 50 : i32
    %175 = vector.broadcast %c50_i32 : i32 to vector<1x104xi32>
    %176 = arith.cmpi slt, %1, %175 : vector<1x104xi32>
    %177 = arith.andi %174, %176 : vector<1x104xi1>
    %cst_41 = arith.constant 0xFF800000 : f32
    %178 = vector.shape_cast %177 : vector<1x104xi1> to vector<1x104xi1>
    %179 = vector.broadcast %178 : vector<1x104xi1> to vector<8x104xi1>
    %180 = vector.broadcast %cst_41 : f32 to vector<8x104xf32>
    %181 = arith.select %179, %0, %180 : vector<8x104xi1>, vector<8x104xf32>
    %cst_42 = arith.constant dense<0xFF800000> : vector<8xf32>
    %182 = vector.multi_reduction <maximumf>, %181, %cst_42 [1] : vector<8x104xf32> to vector<8xf32>
    %183 = vector.shape_cast %182 : vector<8xf32> to vector<8x1xf32>
    %184 = vector.broadcast %183 : vector<8x1xf32> to vector<8x104xf32>
    %185 = arith.cmpf oeq, %0, %184 : vector<8x104xf32>
    %186 = vector.broadcast %177 : vector<1x104xi1> to vector<8x104xi1>
    %187 = arith.andi %186, %185 : vector<8x104xi1>
    %cst_43 = arith.constant 1.000000e+00 : f32
    %188 = vector.broadcast %cst_43 : f32 to vector<8x104xf32>
    %189 = arith.select %187, %188, %172 : vector<8x104xi1>, vector<8x104xf32>
    %c50_i32_44 = arith.constant 50 : i32
    %190 = vector.broadcast %c50_i32_44 : i32 to vector<1x104xi32>
    %191 = arith.cmpi sge, %1, %190 : vector<1x104xi32>
    %c52_i32 = arith.constant 52 : i32
    %192 = vector.broadcast %c52_i32 : i32 to vector<1x104xi32>
    %193 = arith.cmpi slt, %1, %192 : vector<1x104xi32>
    %194 = arith.andi %191, %193 : vector<1x104xi1>
    %cst_45 = arith.constant 0xFF800000 : f32
    %195 = vector.shape_cast %194 : vector<1x104xi1> to vector<1x104xi1>
    %196 = vector.broadcast %195 : vector<1x104xi1> to vector<8x104xi1>
    %197 = vector.broadcast %cst_45 : f32 to vector<8x104xf32>
    %198 = arith.select %196, %0, %197 : vector<8x104xi1>, vector<8x104xf32>
    %cst_46 = arith.constant dense<0xFF800000> : vector<8xf32>
    %199 = vector.multi_reduction <maximumf>, %198, %cst_46 [1] : vector<8x104xf32> to vector<8xf32>
    %200 = vector.shape_cast %199 : vector<8xf32> to vector<8x1xf32>
    %201 = vector.broadcast %200 : vector<8x1xf32> to vector<8x104xf32>
    %202 = arith.cmpf oeq, %0, %201 : vector<8x104xf32>
    %203 = vector.broadcast %194 : vector<1x104xi1> to vector<8x104xi1>
    %204 = arith.andi %203, %202 : vector<8x104xi1>
    %cst_47 = arith.constant 1.000000e+00 : f32
    %205 = vector.broadcast %cst_47 : f32 to vector<8x104xf32>
    %206 = arith.select %204, %205, %189 : vector<8x104xi1>, vector<8x104xf32>
    %c52_i32_48 = arith.constant 52 : i32
    %207 = vector.broadcast %c52_i32_48 : i32 to vector<1x104xi32>
    %208 = arith.cmpi sge, %1, %207 : vector<1x104xi32>
    %c57_i32 = arith.constant 57 : i32
    %209 = vector.broadcast %c57_i32 : i32 to vector<1x104xi32>
    %210 = arith.cmpi slt, %1, %209 : vector<1x104xi32>
    %211 = arith.andi %208, %210 : vector<1x104xi1>
    %cst_49 = arith.constant 0xFF800000 : f32
    %212 = vector.shape_cast %211 : vector<1x104xi1> to vector<1x104xi1>
    %213 = vector.broadcast %212 : vector<1x104xi1> to vector<8x104xi1>
    %214 = vector.broadcast %cst_49 : f32 to vector<8x104xf32>
    %215 = arith.select %213, %0, %214 : vector<8x104xi1>, vector<8x104xf32>
    %cst_50 = arith.constant dense<0xFF800000> : vector<8xf32>
    %216 = vector.multi_reduction <maximumf>, %215, %cst_50 [1] : vector<8x104xf32> to vector<8xf32>
    %217 = vector.shape_cast %216 : vector<8xf32> to vector<8x1xf32>
    %218 = vector.broadcast %217 : vector<8x1xf32> to vector<8x104xf32>
    %219 = arith.cmpf oeq, %0, %218 : vector<8x104xf32>
    %220 = vector.broadcast %211 : vector<1x104xi1> to vector<8x104xi1>
    %221 = arith.andi %220, %219 : vector<8x104xi1>
    %cst_51 = arith.constant 1.000000e+00 : f32
    %222 = vector.broadcast %cst_51 : f32 to vector<8x104xf32>
    %223 = arith.select %221, %222, %206 : vector<8x104xi1>, vector<8x104xf32>
    %c57_i32_52 = arith.constant 57 : i32
    %224 = vector.broadcast %c57_i32_52 : i32 to vector<1x104xi32>
    %225 = arith.cmpi sge, %1, %224 : vector<1x104xi32>
    %c63_i32 = arith.constant 63 : i32
    %226 = vector.broadcast %c63_i32 : i32 to vector<1x104xi32>
    %227 = arith.cmpi slt, %1, %226 : vector<1x104xi32>
    %228 = arith.andi %225, %227 : vector<1x104xi1>
    %cst_53 = arith.constant 0xFF800000 : f32
    %229 = vector.shape_cast %228 : vector<1x104xi1> to vector<1x104xi1>
    %230 = vector.broadcast %229 : vector<1x104xi1> to vector<8x104xi1>
    %231 = vector.broadcast %cst_53 : f32 to vector<8x104xf32>
    %232 = arith.select %230, %0, %231 : vector<8x104xi1>, vector<8x104xf32>
    %cst_54 = arith.constant dense<0xFF800000> : vector<8xf32>
    %233 = vector.multi_reduction <maximumf>, %232, %cst_54 [1] : vector<8x104xf32> to vector<8xf32>
    %234 = vector.shape_cast %233 : vector<8xf32> to vector<8x1xf32>
    %235 = vector.broadcast %234 : vector<8x1xf32> to vector<8x104xf32>
    %236 = arith.cmpf oeq, %0, %235 : vector<8x104xf32>
    %237 = vector.broadcast %228 : vector<1x104xi1> to vector<8x104xi1>
    %238 = arith.andi %237, %236 : vector<8x104xi1>
    %cst_55 = arith.constant 1.000000e+00 : f32
    %239 = vector.broadcast %cst_55 : f32 to vector<8x104xf32>
    %240 = arith.select %238, %239, %223 : vector<8x104xi1>, vector<8x104xf32>
    %c63_i32_56 = arith.constant 63 : i32
    %241 = vector.broadcast %c63_i32_56 : i32 to vector<1x104xi32>
    %242 = arith.cmpi sge, %1, %241 : vector<1x104xi32>
    %c65_i32 = arith.constant 65 : i32
    %243 = vector.broadcast %c65_i32 : i32 to vector<1x104xi32>
    %244 = arith.cmpi slt, %1, %243 : vector<1x104xi32>
    %245 = arith.andi %242, %244 : vector<1x104xi1>
    %cst_57 = arith.constant 0xFF800000 : f32
    %246 = vector.shape_cast %245 : vector<1x104xi1> to vector<1x104xi1>
    %247 = vector.broadcast %246 : vector<1x104xi1> to vector<8x104xi1>
    %248 = vector.broadcast %cst_57 : f32 to vector<8x104xf32>
    %249 = arith.select %247, %0, %248 : vector<8x104xi1>, vector<8x104xf32>
    %cst_58 = arith.constant dense<0xFF800000> : vector<8xf32>
    %250 = vector.multi_reduction <maximumf>, %249, %cst_58 [1] : vector<8x104xf32> to vector<8xf32>
    %251 = vector.shape_cast %250 : vector<8xf32> to vector<8x1xf32>
    %252 = vector.broadcast %251 : vector<8x1xf32> to vector<8x104xf32>
    %253 = arith.cmpf oeq, %0, %252 : vector<8x104xf32>
    %254 = vector.broadcast %245 : vector<1x104xi1> to vector<8x104xi1>
    %255 = arith.andi %254, %253 : vector<8x104xi1>
    %cst_59 = arith.constant 1.000000e+00 : f32
    %256 = vector.broadcast %cst_59 : f32 to vector<8x104xf32>
    %257 = arith.select %255, %256, %240 : vector<8x104xi1>, vector<8x104xf32>
    %c65_i32_60 = arith.constant 65 : i32
    %258 = vector.broadcast %c65_i32_60 : i32 to vector<1x104xi32>
    %259 = arith.cmpi sge, %1, %258 : vector<1x104xi32>
    %c70_i32 = arith.constant 70 : i32
    %260 = vector.broadcast %c70_i32 : i32 to vector<1x104xi32>
    %261 = arith.cmpi slt, %1, %260 : vector<1x104xi32>
    %262 = arith.andi %259, %261 : vector<1x104xi1>
    %cst_61 = arith.constant 0xFF800000 : f32
    %263 = vector.shape_cast %262 : vector<1x104xi1> to vector<1x104xi1>
    %264 = vector.broadcast %263 : vector<1x104xi1> to vector<8x104xi1>
    %265 = vector.broadcast %cst_61 : f32 to vector<8x104xf32>
    %266 = arith.select %264, %0, %265 : vector<8x104xi1>, vector<8x104xf32>
    %cst_62 = arith.constant dense<0xFF800000> : vector<8xf32>
    %267 = vector.multi_reduction <maximumf>, %266, %cst_62 [1] : vector<8x104xf32> to vector<8xf32>
    %268 = vector.shape_cast %267 : vector<8xf32> to vector<8x1xf32>
    %269 = vector.broadcast %268 : vector<8x1xf32> to vector<8x104xf32>
    %270 = arith.cmpf oeq, %0, %269 : vector<8x104xf32>
    %271 = vector.broadcast %262 : vector<1x104xi1> to vector<8x104xi1>
    %272 = arith.andi %271, %270 : vector<8x104xi1>
    %cst_63 = arith.constant 1.000000e+00 : f32
    %273 = vector.broadcast %cst_63 : f32 to vector<8x104xf32>
    %274 = arith.select %272, %273, %257 : vector<8x104xi1>, vector<8x104xf32>
    %c70_i32_64 = arith.constant 70 : i32
    %275 = vector.broadcast %c70_i32_64 : i32 to vector<1x104xi32>
    %276 = arith.cmpi sge, %1, %275 : vector<1x104xi32>
    %c76_i32 = arith.constant 76 : i32
    %277 = vector.broadcast %c76_i32 : i32 to vector<1x104xi32>
    %278 = arith.cmpi slt, %1, %277 : vector<1x104xi32>
    %279 = arith.andi %276, %278 : vector<1x104xi1>
    %cst_65 = arith.constant 0xFF800000 : f32
    %280 = vector.shape_cast %279 : vector<1x104xi1> to vector<1x104xi1>
    %281 = vector.broadcast %280 : vector<1x104xi1> to vector<8x104xi1>
    %282 = vector.broadcast %cst_65 : f32 to vector<8x104xf32>
    %283 = arith.select %281, %0, %282 : vector<8x104xi1>, vector<8x104xf32>
    %cst_66 = arith.constant dense<0xFF800000> : vector<8xf32>
    %284 = vector.multi_reduction <maximumf>, %283, %cst_66 [1] : vector<8x104xf32> to vector<8xf32>
    %285 = vector.shape_cast %284 : vector<8xf32> to vector<8x1xf32>
    %286 = vector.broadcast %285 : vector<8x1xf32> to vector<8x104xf32>
    %287 = arith.cmpf oeq, %0, %286 : vector<8x104xf32>
    %288 = vector.broadcast %279 : vector<1x104xi1> to vector<8x104xi1>
    %289 = arith.andi %288, %287 : vector<8x104xi1>
    %cst_67 = arith.constant 1.000000e+00 : f32
    %290 = vector.broadcast %cst_67 : f32 to vector<8x104xf32>
    %291 = arith.select %289, %290, %274 : vector<8x104xi1>, vector<8x104xf32>
    %c76_i32_68 = arith.constant 76 : i32
    %292 = vector.broadcast %c76_i32_68 : i32 to vector<1x104xi32>
    %293 = arith.cmpi sge, %1, %292 : vector<1x104xi32>
    %c78_i32 = arith.constant 78 : i32
    %294 = vector.broadcast %c78_i32 : i32 to vector<1x104xi32>
    %295 = arith.cmpi slt, %1, %294 : vector<1x104xi32>
    %296 = arith.andi %293, %295 : vector<1x104xi1>
    %cst_69 = arith.constant 0xFF800000 : f32
    %297 = vector.shape_cast %296 : vector<1x104xi1> to vector<1x104xi1>
    %298 = vector.broadcast %297 : vector<1x104xi1> to vector<8x104xi1>
    %299 = vector.broadcast %cst_69 : f32 to vector<8x104xf32>
    %300 = arith.select %298, %0, %299 : vector<8x104xi1>, vector<8x104xf32>
    %cst_70 = arith.constant dense<0xFF800000> : vector<8xf32>
    %301 = vector.multi_reduction <maximumf>, %300, %cst_70 [1] : vector<8x104xf32> to vector<8xf32>
    %302 = vector.shape_cast %301 : vector<8xf32> to vector<8x1xf32>
    %303 = vector.broadcast %302 : vector<8x1xf32> to vector<8x104xf32>
    %304 = arith.cmpf oeq, %0, %303 : vector<8x104xf32>
    %305 = vector.broadcast %296 : vector<1x104xi1> to vector<8x104xi1>
    %306 = arith.andi %305, %304 : vector<8x104xi1>
    %cst_71 = arith.constant 1.000000e+00 : f32
    %307 = vector.broadcast %cst_71 : f32 to vector<8x104xf32>
    %308 = arith.select %306, %307, %291 : vector<8x104xi1>, vector<8x104xf32>
    %c78_i32_72 = arith.constant 78 : i32
    %309 = vector.broadcast %c78_i32_72 : i32 to vector<1x104xi32>
    %310 = arith.cmpi sge, %1, %309 : vector<1x104xi32>
    %c83_i32 = arith.constant 83 : i32
    %311 = vector.broadcast %c83_i32 : i32 to vector<1x104xi32>
    %312 = arith.cmpi slt, %1, %311 : vector<1x104xi32>
    %313 = arith.andi %310, %312 : vector<1x104xi1>
    %cst_73 = arith.constant 0xFF800000 : f32
    %314 = vector.shape_cast %313 : vector<1x104xi1> to vector<1x104xi1>
    %315 = vector.broadcast %314 : vector<1x104xi1> to vector<8x104xi1>
    %316 = vector.broadcast %cst_73 : f32 to vector<8x104xf32>
    %317 = arith.select %315, %0, %316 : vector<8x104xi1>, vector<8x104xf32>
    %cst_74 = arith.constant dense<0xFF800000> : vector<8xf32>
    %318 = vector.multi_reduction <maximumf>, %317, %cst_74 [1] : vector<8x104xf32> to vector<8xf32>
    %319 = vector.shape_cast %318 : vector<8xf32> to vector<8x1xf32>
    %320 = vector.broadcast %319 : vector<8x1xf32> to vector<8x104xf32>
    %321 = arith.cmpf oeq, %0, %320 : vector<8x104xf32>
    %322 = vector.broadcast %313 : vector<1x104xi1> to vector<8x104xi1>
    %323 = arith.andi %322, %321 : vector<8x104xi1>
    %cst_75 = arith.constant 1.000000e+00 : f32
    %324 = vector.broadcast %cst_75 : f32 to vector<8x104xf32>
    %325 = arith.select %323, %324, %308 : vector<8x104xi1>, vector<8x104xf32>
    %c83_i32_76 = arith.constant 83 : i32
    %326 = vector.broadcast %c83_i32_76 : i32 to vector<1x104xi32>
    %327 = arith.cmpi sge, %1, %326 : vector<1x104xi32>
    %c89_i32 = arith.constant 89 : i32
    %328 = vector.broadcast %c89_i32 : i32 to vector<1x104xi32>
    %329 = arith.cmpi slt, %1, %328 : vector<1x104xi32>
    %330 = arith.andi %327, %329 : vector<1x104xi1>
    %cst_77 = arith.constant 0xFF800000 : f32
    %331 = vector.shape_cast %330 : vector<1x104xi1> to vector<1x104xi1>
    %332 = vector.broadcast %331 : vector<1x104xi1> to vector<8x104xi1>
    %333 = vector.broadcast %cst_77 : f32 to vector<8x104xf32>
    %334 = arith.select %332, %0, %333 : vector<8x104xi1>, vector<8x104xf32>
    %cst_78 = arith.constant dense<0xFF800000> : vector<8xf32>
    %335 = vector.multi_reduction <maximumf>, %334, %cst_78 [1] : vector<8x104xf32> to vector<8xf32>
    %336 = vector.shape_cast %335 : vector<8xf32> to vector<8x1xf32>
    %337 = vector.broadcast %336 : vector<8x1xf32> to vector<8x104xf32>
    %338 = arith.cmpf oeq, %0, %337 : vector<8x104xf32>
    %339 = vector.broadcast %330 : vector<1x104xi1> to vector<8x104xi1>
    %340 = arith.andi %339, %338 : vector<8x104xi1>
    %cst_79 = arith.constant 1.000000e+00 : f32
    %341 = vector.broadcast %cst_79 : f32 to vector<8x104xf32>
    %342 = arith.select %340, %341, %325 : vector<8x104xi1>, vector<8x104xf32>
    %c89_i32_80 = arith.constant 89 : i32
    %343 = vector.broadcast %c89_i32_80 : i32 to vector<1x104xi32>
    %344 = arith.cmpi sge, %1, %343 : vector<1x104xi32>
    %c91_i32 = arith.constant 91 : i32
    %345 = vector.broadcast %c91_i32 : i32 to vector<1x104xi32>
    %346 = arith.cmpi slt, %1, %345 : vector<1x104xi32>
    %347 = arith.andi %344, %346 : vector<1x104xi1>
    %cst_81 = arith.constant 0xFF800000 : f32
    %348 = vector.shape_cast %347 : vector<1x104xi1> to vector<1x104xi1>
    %349 = vector.broadcast %348 : vector<1x104xi1> to vector<8x104xi1>
    %350 = vector.broadcast %cst_81 : f32 to vector<8x104xf32>
    %351 = arith.select %349, %0, %350 : vector<8x104xi1>, vector<8x104xf32>
    %cst_82 = arith.constant dense<0xFF800000> : vector<8xf32>
    %352 = vector.multi_reduction <maximumf>, %351, %cst_82 [1] : vector<8x104xf32> to vector<8xf32>
    %353 = vector.shape_cast %352 : vector<8xf32> to vector<8x1xf32>
    %354 = vector.broadcast %353 : vector<8x1xf32> to vector<8x104xf32>
    %355 = arith.cmpf oeq, %0, %354 : vector<8x104xf32>
    %356 = vector.broadcast %347 : vector<1x104xi1> to vector<8x104xi1>
    %357 = arith.andi %356, %355 : vector<8x104xi1>
    %cst_83 = arith.constant 1.000000e+00 : f32
    %358 = vector.broadcast %cst_83 : f32 to vector<8x104xf32>
    %359 = arith.select %357, %358, %342 : vector<8x104xi1>, vector<8x104xf32>
    %c91_i32_84 = arith.constant 91 : i32
    %360 = vector.broadcast %c91_i32_84 : i32 to vector<1x104xi32>
    %361 = arith.cmpi sge, %1, %360 : vector<1x104xi32>
    %c96_i32 = arith.constant 96 : i32
    %362 = vector.broadcast %c96_i32 : i32 to vector<1x104xi32>
    %363 = arith.cmpi slt, %1, %362 : vector<1x104xi32>
    %364 = arith.andi %361, %363 : vector<1x104xi1>
    %cst_85 = arith.constant 0xFF800000 : f32
    %365 = vector.shape_cast %364 : vector<1x104xi1> to vector<1x104xi1>
    %366 = vector.broadcast %365 : vector<1x104xi1> to vector<8x104xi1>
    %367 = vector.broadcast %cst_85 : f32 to vector<8x104xf32>
    %368 = arith.select %366, %0, %367 : vector<8x104xi1>, vector<8x104xf32>
    %cst_86 = arith.constant dense<0xFF800000> : vector<8xf32>
    %369 = vector.multi_reduction <maximumf>, %368, %cst_86 [1] : vector<8x104xf32> to vector<8xf32>
    %370 = vector.shape_cast %369 : vector<8xf32> to vector<8x1xf32>
    %371 = vector.broadcast %370 : vector<8x1xf32> to vector<8x104xf32>
    %372 = arith.cmpf oeq, %0, %371 : vector<8x104xf32>
    %373 = vector.broadcast %364 : vector<1x104xi1> to vector<8x104xi1>
    %374 = arith.andi %373, %372 : vector<8x104xi1>
    %cst_87 = arith.constant 1.000000e+00 : f32
    %375 = vector.broadcast %cst_87 : f32 to vector<8x104xf32>
    %376 = arith.select %374, %375, %359 : vector<8x104xi1>, vector<8x104xf32>
    %c96_i32_88 = arith.constant 96 : i32
    %377 = vector.broadcast %c96_i32_88 : i32 to vector<1x104xi32>
    %378 = arith.cmpi sge, %1, %377 : vector<1x104xi32>
    %c102_i32 = arith.constant 102 : i32
    %379 = vector.broadcast %c102_i32 : i32 to vector<1x104xi32>
    %380 = arith.cmpi slt, %1, %379 : vector<1x104xi32>
    %381 = arith.andi %378, %380 : vector<1x104xi1>
    %cst_89 = arith.constant 0xFF800000 : f32
    %382 = vector.shape_cast %381 : vector<1x104xi1> to vector<1x104xi1>
    %383 = vector.broadcast %382 : vector<1x104xi1> to vector<8x104xi1>
    %384 = vector.broadcast %cst_89 : f32 to vector<8x104xf32>
    %385 = arith.select %383, %0, %384 : vector<8x104xi1>, vector<8x104xf32>
    %cst_90 = arith.constant dense<0xFF800000> : vector<8xf32>
    %386 = vector.multi_reduction <maximumf>, %385, %cst_90 [1] : vector<8x104xf32> to vector<8xf32>
    %387 = vector.shape_cast %386 : vector<8xf32> to vector<8x1xf32>
    %388 = vector.broadcast %387 : vector<8x1xf32> to vector<8x104xf32>
    %389 = arith.cmpf oeq, %0, %388 : vector<8x104xf32>
    %390 = vector.broadcast %381 : vector<1x104xi1> to vector<8x104xi1>
    %391 = arith.andi %390, %389 : vector<8x104xi1>
    %cst_91 = arith.constant 1.000000e+00 : f32
    %392 = vector.broadcast %cst_91 : f32 to vector<8x104xf32>
    %393 = arith.select %391, %392, %376 : vector<8x104xi1>, vector<8x104xf32>
    %c102_i32_92 = arith.constant 102 : i32
    %394 = vector.broadcast %c102_i32_92 : i32 to vector<1x104xi32>
    %395 = arith.cmpi sge, %1, %394 : vector<1x104xi32>
    %c104_i32 = arith.constant 104 : i32
    %396 = vector.broadcast %c104_i32 : i32 to vector<1x104xi32>
    %397 = arith.cmpi slt, %1, %396 : vector<1x104xi32>
    %398 = arith.andi %395, %397 : vector<1x104xi1>
    %cst_93 = arith.constant 0xFF800000 : f32
    %399 = vector.shape_cast %398 : vector<1x104xi1> to vector<1x104xi1>
    %400 = vector.broadcast %399 : vector<1x104xi1> to vector<8x104xi1>
    %401 = vector.broadcast %cst_93 : f32 to vector<8x104xf32>
    %402 = arith.select %400, %0, %401 : vector<8x104xi1>, vector<8x104xf32>
    %cst_94 = arith.constant dense<0xFF800000> : vector<8xf32>
    %403 = vector.multi_reduction <maximumf>, %402, %cst_94 [1] : vector<8x104xf32> to vector<8xf32>
    %404 = vector.shape_cast %403 : vector<8xf32> to vector<8x1xf32>
    %405 = vector.broadcast %404 : vector<8x1xf32> to vector<8x104xf32>
    %406 = arith.cmpf oeq, %0, %405 : vector<8x104xf32>
    %407 = vector.broadcast %398 : vector<1x104xi1> to vector<8x104xi1>
    %408 = arith.andi %407, %406 : vector<8x104xi1>
    %cst_95 = arith.constant 1.000000e+00 : f32
    %409 = vector.broadcast %cst_95 : f32 to vector<8x104xf32>
    %410 = arith.select %408, %409, %393 : vector<8x104xi1>, vector<8x104xf32>
    %c0_96 = arith.constant 0 : index
    %c0_97 = arith.constant 0 : index
    %411 = vector.load %arg2[%c0_96, %c0_97] : memref<104x104xf32, #tpu.memory_space<vmem>>, vector<104x104xf32>
    %cst_98 = arith.constant dense<0.000000e+00> : vector<8x104xf32>
    %412 = tpu.matmul %410, %411, %cst_98 {dimension_numbers = #tpu.dot_dimension_numbers<[1], [0], [0], [1], [0, 0, 1, 1], [], []>} : vector<8x104xf32>, vector<104x104xf32>, vector<8x104xf32> -> vector<8x104xf32>
    %cst_99 = arith.constant 1.000000e+00 : f32
    %413 = vector.broadcast %cst_99 : f32 to vector<8x104xf32>
    %414 = arith.cmpf oeq, %412, %413 : vector<8x104xf32>
    %cst_100 = arith.constant 0.000000e+00 : f32
    %415 = vector.broadcast %cst_100 : f32 to vector<8x104xf32>
    %416 = arith.select %414, %410, %415 : vector<8x104xi1>, vector<8x104xf32>
    %c0_101 = arith.constant 0 : index
    %c0_102 = arith.constant 0 : index
    %417 = vector.load %arg3[%c0_101, %c0_102] : memref<104x256xf32, #tpu.memory_space<vmem>>, vector<104x256xf32>
    %cst_103 = arith.constant dense<0.000000e+00> : vector<8x256xf32>
    %418 = tpu.matmul %416, %417, %cst_103 {dimension_numbers = #tpu.dot_dimension_numbers<[1], [0], [0], [1], [0, 0, 1, 1], [], []>, precision = #tpu.contract_precision<fp32>} : vector<8x104xf32>, vector<104x256xf32>, vector<8x256xf32> -> vector<8x256xf32>
    %c0_104 = arith.constant 0 : index
    %c0_105 = arith.constant 0 : index
    %419 = vector.load %arg4[%c0_104, %c0_105] : memref<8x256xf32, #tpu.memory_space<vmem>>, vector<8x256xf32>
    tpu.vector_store %arg4[%c0_104, %c0_105], %418 {strides = array<i32>} : memref<8x256xf32, #tpu.memory_space<vmem>>, vector<8x256xf32>,
    return
  }
  func.func @transform_0(%arg0: i32) -> (i32, i32) {
    %c0_i32 = arith.constant 0 : i32
    %c0_i32_0 = arith.constant 0 : i32
    return %arg0, %c0_i32 : i32, i32
  }
  func.func @transform_1(%arg0: i32) -> (i32, i32) {
    %c0_i32 = arith.constant 0 : i32
    %c0_i32_0 = arith.constant 0 : i32
    %c0_i32_1 = arith.constant 0 : i32
    return %c0_i32, %c0_i32_0 : i32, i32
  }
  func.func @transform_2(%arg0: i32) -> (i32, i32) {
    %c0_i32 = arith.constant 0 : i32
    %c0_i32_0 = arith.constant 0 : i32
    %c0_i32_1 = arith.constant 0 : i32
    return %c0_i32, %c0_i32_0 : i32, i32
  }
  func.func @transform_3(%arg0: i32) -> (i32, i32) {
    %c0_i32 = arith.constant 0 : i32
    %c0_i32_0 = arith.constant 0 : i32
    return %arg0, %c0_i32 : i32, i32
  }
}

</mosaic_0001>

<bundles_post_ra>
// kernel: bond_encoder.1
= control target key start
LH: loop header
LB: loop body
LE: loop exit
PB: predicated region body
PF: predicated region fallthrough
CT: control target
= control target key end

     0   :  { %s1680_s12 = smov 0   ;;  %s2478_s0 = inlined_call_operand.vmem [shape: f32[16,104], index: 0, kind: input, shape index: {}]   ;;  %s2479_s1 = inlined_call_operand.vmem [shape: f32[104,104], index: 1, kind: input, shape index: {}]   ;;  %s2480_s2 = inlined_call_operand.vmem [shape: f32[104,256], index: 2, kind: input, shape index: {}]   ;;  %s2481_s3 = inlined_call_operand.vmem [shape: f32[16,256], index: 3, kind: output, shape index: {}]  }
   0x1 LB: > { %s1411_s13 = sadd.s32 4294967295, %s1655_s12   ;;  %p1415_p0 = scmp.ge.s32.totalorder %s1655_s12, 1  ;;  %s1655_s12 = sphi %s1680_s12, %s13_s12  }
   0x2   : > { %p136_p1 = scmp.lt.s32.totalorder %s1655_s12, 3 }
   0x4   : > { %p137_p2 = pnand %p1415_p0, %p136_p1 }
   0x6   : > { %140 = sbr.rel (%p137_p2) target bundleno = 724 (0x2d4), region = 32 }
   0xd   : > { %p159_p3 = scmp.lt.s32.totalorder %s1411_s13, 1  ;;  %v169_v0 = vlaneseq  ;;  %v2498_v1 = vmov 0.0   ;;  %vm2483_vm0 = vcmask 850944   ;;  %v2532_v14 = vmov 0  ;;  %v571_v62 = vld [vmem:[%s2480_s2 + $0xb8] sm:$0xff] }
   0xe   : > { %997 = vmatprep.mubr.f32.mxu1 %v2498_v1  ;;  %v2534_v19 = vmov 0  ;;  %v2536_v20 = vmov 0  ;;  %v2538_v25 = vmov 0  ;;  %v2540_v26 = vmov 0 }
   0xf   : > { %s2637_s13 = smov (!%p159_p3, %s1411_s13), 1  ;;  %v1691_v2 = vand.u32 127, %v169_v0  ;;  %v2544_v31 = vmov 0  ;;  %v2546_v32 = vmov 0  ;;  %v2550_v37 = vmov 0 }
  0x10   : > { %s1416_s14 = sshll.u32 %s2637_s13, 3  ;;  %v2552_v38 = vmov 0  ;;  %v2556_v43 = vmov 0  ;;  %v2558_v44 = vmov 0  ;;  %v2562_v49 = vmov 0  ;;  %s1422_s21 = sshll.u32 %s2637_s13, 4 }
  0x11   : > { %vm2482_vm1 = vcmp.lt.s32.totalorder %v1691_v2, 5  ;;  %vm196_vm2 = vcmp.ge.s32.totalorder %v1691_v2, 11  ;;  %vm197_vm3 = vcmp.lt.s32.totalorder %v1691_v2, 13  ;;  %vm184_vm4 = vcmp.ge.s32.totalorder %v1691_v2, 5  ;;  %s162_s17 = scalar_lea.vmem %s2478_s0, %s1416_s14  ;;  %s167_s24 = scalar_lea.vmem %s2481_s3, %s1422_s21 }
  0x12   : > { %vm1701_vm5 = vmand %vm196_vm2, %vm197_vm3  ;;  %vm185_vm6 = vcmp.lt.s32.totalorder %v1691_v2, 11  ;;  %vm208_vm7 = vcmp.ge.s32.totalorder %v1691_v2, 13  ;;  %vm209_vm8 = vcmp.lt.s32.totalorder %v1691_v2, 18  ;;  %vm220_vm9 = vcmp.ge.s32.totalorder %v1691_v2, 18  ;;  %v1709_v4 = vld [vmem:[%s162_s17] sm:$0xff] }
  0x13   : > { %vm1711_vm10 = vmand %vm184_vm4, %vm185_vm6  ;;  %vm221_vm11 = vcmp.lt.s32.totalorder %v1691_v2, 24  ;;  %vm232_vm12 = vcmp.ge.s32.totalorder %v1691_v2, 24  ;;  %vm233_vm13 = vcmp.lt.s32.totalorder %v1691_v2, 26  ;;  %v176_v6 = vsel %vm2482_vm1, %v1709_v4, -inf }
  0x14   : > { %v201_v7 = vsel %vm1701_vm5, %v1709_v4, -inf  ;;  %v189_v8 = vsel %vm1711_vm10, %v1709_v4, -inf  ;;  %vm1727_vm14 = vmand %vm208_vm7, %vm209_vm8  ;;  %vm244_vm15 = vcmp.ge.s32.totalorder %v1691_v2, 26  ;;  %v178_v10 = vsel %vm2483_vm0, %v176_v6, -inf }
  0x15   : > { %v202_v11 = vsel %vm2483_vm0, %v201_v7, -inf  ;;  %v213_v12 = vsel %vm1727_vm14, %v1709_v4, -inf  ;;  %vm1737_vm2 = vmand %vm220_vm9, %vm221_vm11  ;;  %vm245_vm3 = vcmp.lt.s32.totalorder %v1691_v2, 31  ;;  %179 = vmax.xlane.f32.xlu0 %v178_v10  ;;  %vm256_vm6 = vcmp.ge.s32.totalorder %v1691_v2, 31  ;;  %v460_v10 = vld [vmem:[%s2479_s1] sm:$0xff] }
  0x16   : > { %203 = vmax.xlane.f32.xlu1 %v202_v11  ;;  %vm1742_vm4 = vmand %vm232_vm12, %vm233_vm13  ;;  %vm257_vm7 = vcmp.lt.s32.totalorder %v1691_v2, 37  ;;  %v190_v15 = vsel %vm2483_vm0, %v189_v8, -inf  ;;  %v214_v16 = vsel %vm2483_vm0, %v213_v12, -inf  ;;  %v225_v17 = vsel %vm1737_vm2, %v1709_v4, -inf  ;;  %v461_v11 = vld [vmem:[%s2479_s1 + $0x8] sm:$0xff] }
  0x17   : > { %v2533_v14 = vsel %vm1742_vm4, 4294967295, %v2532_v14  ;;  %v237_v18 = vsel %vm1742_vm4, %v1709_v4, -inf  ;;  %vm1758_vm8 = vmand %vm244_vm15, %vm245_vm3  ;;  %vm268_vm11 = vcmp.ge.s32.totalorder %v1691_v2, 37  ;;  %vm269_vm12 = vcmp.lt.s32.totalorder %v1691_v2, 39 }
  0x18   : > { %v2535_v19 = vsel %vm1758_vm8, 4294967295, %v2534_v19  ;;  %vm1762_vm9 = vmand %vm256_vm6, %vm257_vm7  ;;  %vm280_vm13 = vcmp.ge.s32.totalorder %v1691_v2, 39  ;;  %vm281_vm1 = vcmp.lt.s32.totalorder %v1691_v2, 44  ;;  %v226_v21 = vsel %vm2483_vm0, %v225_v17, -inf }
  0x19   : > { %v2537_v20 = vsel %vm1762_vm9, 4294967295, %v2536_v20  ;;  %191 = vmax.xlane.f32.xlu0 %v190_v15  ;;  %v238_v22 = vsel %vm2483_vm0, %v237_v18, -inf  ;;  %v249_v23 = vsel %vm1758_vm8, %v1709_v4, -inf  ;;  %v261_v24 = vsel %vm1762_vm9, %v1709_v4, -inf  ;;  %vm1778_vm15 = vmand %vm268_vm11, %vm269_vm12 }
  0x1a   : > { %215 = vmax.xlane.f32.xlu1 %v214_v16  ;;  %v2539_v25 = vsel %vm1778_vm15, 4294967295, %v2538_v25  ;;  %vm1782_vm3 = vmand %vm280_vm13, %vm281_vm1  ;;  %vm292_vm6 = vcmp.ge.s32.totalorder %v1691_v2, 44  ;;  %vm293_vm7 = vcmp.lt.s32.totalorder %v1691_v2, 50  ;;  %vm304_vm0 = vcmp.ge.s32.totalorder %v1691_v2, 50 }
  0x1b   : > { %v2541_v26 = vsel %vm1782_vm3, 4294967295, %v2540_v26  ;;  %vm305_vm8 = vcmp.lt.s32.totalorder %v1691_v2, 52  ;;  %vm2542_vm4 = vcmask 850944   ;;  %v273_v29 = vsel %vm1778_vm15, %v1709_v4, -inf  ;;  %vm1798_vm1 = vmand %vm292_vm6, %vm293_vm7 }
  0x1c   : > { %v250_v27 = vsel %vm2542_vm4, %v249_v23, -inf  ;;  %vm2543_vm11 = vmmov %vm2542_vm4  ;;  %v285_v30 = vsel %vm1782_vm3, %v1709_v4, -inf  ;;  %v2545_v31 = vsel %vm1798_vm1, 4294967295, %v2544_v31  ;;  %vm316_vm4 = vcmp.ge.s32.totalorder %v1691_v2, 52  ;;  %v462_v23 = vld [vmem:[%s2479_s1 + $0x10] sm:$0xff] }
  0x1d   : > { %227 = vmax.xlane.f32.xlu0 %v226_v21  ;;  %v262_v28 = vsel %vm2543_vm11, %v261_v24, -inf  ;;  %vm1802_vm12 = vmand %vm304_vm0, %vm305_vm8  ;;  %vm317_vm13 = vcmp.lt.s32.totalorder %v1691_v2, 57  ;;  %vm328_vm11 = vcmp.ge.s32.totalorder %v1691_v2, 57  ;;  %vm329_vm15 = vcmp.lt.s32.totalorder %v1691_v2, 63  ;;  %v463_v24 = vld [vmem:[%s2479_s1 + $0x18] sm:$0xff] }
  0x1e   : > { %239 = vmax.xlane.f32.xlu1 %v238_v22  ;;  %v2547_v32 = vsel %vm1802_vm12, 4294967295, %v2546_v32  ;;  %vm2548_vm9 = vcmask 850944   ;;  %v297_v35 = vsel %vm1798_vm1, %v1709_v4, -inf  ;;  %v309_v36 = vsel %vm1802_vm12, %v1709_v4, -inf  ;;  %vm1818_vm0 = vmand %vm316_vm4, %vm317_vm13 }
  0x1f   : > { %v274_v33 = vsel %vm2548_vm9, %v273_v29, -inf  ;;  %vm2549_vm6 = vmmov %vm2548_vm9  ;;  %v2551_v37 = vsel %vm1818_vm0, 4294967295, %v2550_v37  ;;  %vm340_vm9 = vcmp.ge.s32.totalorder %v1691_v2, 63  ;;  %vm341_vm7 = vcmp.lt.s32.totalorder %v1691_v2, 65 }
  0x20   : > { %v286_v34 = vsel %vm2549_vm6, %v285_v30, -inf  ;;  %vm1822_vm8 = vmand %vm328_vm11, %vm329_vm15  ;;  %vm352_vm6 = vcmp.ge.s32.totalorder %v1691_v2, 65  ;;  %vm353_vm1 = vcmp.lt.s32.totalorder %v1691_v2, 70  ;;  %vm2554_vm3 = vcmask 850944   ;;  %v464_v30 = vld [vmem:[%s2479_s1 + $0x20] sm:$0xff] }
  0x21   : > { %251 = vmax.xlane.f32.xlu0 %v250_v27  ;;  %v2553_v38 = vsel %vm1822_vm8, 4294967295, %v2552_v38  ;;  %v298_v39 = vsel %vm2554_vm3, %v297_v35, -inf  ;;  %vm2555_vm4 = vmmov %vm2554_vm3  ;;  %v321_v41 = vsel %vm1818_vm0, %v1709_v4, -inf  ;;  %v333_v42 = vsel %vm1822_vm8, %v1709_v4, -inf  ;;  %v466_v35 = vld [vmem:[%s2479_s1 + $0x30] sm:$0xff] }
  0x22   : > { %263 = vmax.xlane.f32.xlu1 %v262_v28  ;;  %v310_v40 = vsel %vm2555_vm4, %v309_v36, -inf  ;;  %vm1838_vm15 = vmand %vm340_vm9, %vm341_vm7  ;;  %vm364_vm3 = vcmp.ge.s32.totalorder %v1691_v2, 70  ;;  %vm365_vm11 = vcmp.lt.s32.totalorder %v1691_v2, 76  ;;  %vm376_vm4 = vcmp.ge.s32.totalorder %v1691_v2, 76  ;;  %v467_v36 = vld [vmem:[%s2479_s1 + $0x38] sm:$0xff] }
  0x23   : > { %v2557_v43 = vsel %vm1838_vm15, 4294967295, %v2556_v43  ;;  %vm1842_vm13 = vmand %vm352_vm6, %vm353_vm1  ;;  %vm377_vm0 = vcmp.lt.s32.totalorder %v1691_v2, 78  ;;  %vm2560_vm12 = vcmask 850944   ;;  %v345_v47 = vsel %vm1838_vm15, %v1709_v4, -inf }
  0x24   : > { %v2559_v44 = vsel %vm1842_vm13, 4294967295, %v2558_v44  ;;  %v322_v45 = vsel %vm2560_vm12, %v321_v41, -inf  ;;  %vm2561_vm9 = vmmov %vm2560_vm12  ;;  %v357_v48 = vsel %vm1842_vm13, %v1709_v4, -inf  ;;  %v2564_v50 = vmov 0  ;;  %v469_v41 = vld [vmem:[%s2479_s1 + $0x48] sm:$0xff] }
  0x25   : > { %275 = vmax.xlane.f32.xlu0 %v274_v33  ;;  %v334_v46 = vsel %vm2561_vm9, %v333_v42, -inf  ;;  %vm1858_vm1 = vmand %vm364_vm3, %vm365_vm11  ;;  %vm388_vm12 = vcmp.ge.s32.totalorder %v1691_v2, 78  ;;  %vm389_vm6 = vcmp.lt.s32.totalorder %v1691_v2, 83  ;;  %vm400_vm9 = vcmp.ge.s32.totalorder %v1691_v2, 83  ;;  %v465_v33 = vld [vmem:[%s2479_s1 + $0x28] sm:$0xff] }
  0x26   : > { %287 = vmax.xlane.f32.xlu1 %v286_v34  ;;  %v2563_v49 = vsel %vm1858_vm1, 4294967295, %v2562_v49  ;;  %vm1862_vm7 = vmand %vm376_vm4, %vm377_vm0  ;;  %vm401_vm15 = vcmp.lt.s32.totalorder %v1691_v2, 89  ;;  %vm2566_vm8 = vcmask 850944   ;;  %v369_v53 = vsel %vm1858_vm1, %v1709_v4, -inf }
  0x27   : > { %v2565_v50 = vsel %vm1862_vm7, 4294967295, %v2564_v50  ;;  %v346_v51 = vsel %vm2566_vm8, %v345_v47, -inf  ;;  %vm2567_vm3 = vmmov %vm2566_vm8  ;;  %v381_v54 = vsel %vm1862_vm7, %v1709_v4, -inf  ;;  %v2568_v55 = vmov 0 }
  0x28   : > { %v358_v52 = vsel %vm2567_vm3, %v357_v48, -inf  ;;  %vm1878_vm0 = vmand %vm388_vm12, %vm389_vm6  ;;  %vm412_vm8 = vcmp.ge.s32.totalorder %v1691_v2, 89  ;;  %vm413_vm4 = vcmp.lt.s32.totalorder %v1691_v2, 91  ;;  %vm424_vm3 = vcmp.ge.s32.totalorder %v1691_v2, 91  ;;  %v472_v48 = vld [vmem:[%s2479_s1 + $0x60] sm:$0xff] }
  0x29   : > { %299 = vmax.xlane.f32.xlu0 %v298_v39  ;;  %v2569_v55 = vsel %vm1878_vm0, 4294967295, %v2568_v55  ;;  %vm1882_vm11 = vmand %vm400_vm9, %vm401_vm15  ;;  %vm425_vm1 = vcmp.lt.s32.totalorder %v1691_v2, 96  ;;  %vm2572_vm13 = vcmask 850944   ;;  %v393_v59 = vsel %vm1878_vm0, %v1709_v4, -inf }
  0x2a   : > { %311 = vmax.xlane.f32.xlu1 %v310_v40  ;;  %v370_v57 = vsel %vm2572_vm13, %v369_v53, -inf  ;;  %vm2573_vm12 = vmmov %vm2572_vm13  ;;  %v405_v60 = vsel %vm1882_vm11, %v1709_v4, -inf  ;;  %vm436_vm13 = vcmp.ge.s32.totalorder %v1691_v2, 96  ;;  %vm437_vm9 = vcmp.lt.s32.totalorder %v1691_v2, 102  ;;  %v468_v40 = vld [vmem:[%s2479_s1 + $0x40] sm:$0xff] }
  0x2b   : > { %v382_v58 = vsel %vm2573_vm12, %v381_v54, -inf  ;;  %vm1898_vm15 = vmand %vm412_vm8, %vm413_vm4  ;;  %vm448_vm12 = vcmp.ge.s32.totalorder %v1691_v2, 102  ;;  %vm449_vm0 = vcmp.lt.s32.totalorder %v1691_v2, 104  ;;  %vm2578_vm7 = vcmask 850944   ;;  %v548_v53 = vld [vmem:[%s2480_s2] sm:$0xff] }
  0x2c   : > { %vm1902_vm6 = vmand %vm424_vm3, %vm425_vm1  ;;  %v394_v63 = vsel %vm2578_vm7, %v393_v59, -inf  ;;  %v417_v6 = vsel %vm1898_vm15, %v1709_v4, -inf  ;;  %v2580_v8 = vmov 0  ;;  %v2582_v12 = vmov 0 }
  0x2d   : > { %323 = vmax.xlane.f32.xlu0 %v322_v45  ;;  %vm2579_vm8 = vmmov %vm2578_vm7  ;;  %v429_v7 = vsel %vm1902_vm6, %v1709_v4, -inf  ;;  %v1467_v15 = vpack.c.bf16 %v461_v11, %v460_v10  ;;  %v1658_v18 = vmov 0.0|0.0   ;;  %v1470_v27 = vpack.c.bf16 %v463_v24, %v462_v23  ;;  %v470_v45 = vld [vmem:[%s2479_s1 + $0x50] sm:$0xff]  ;;  %v552_v10 = vld [vmem:[%s2480_s2 + $0x20] sm:$0xff] }
  0x2e   : > { %335 = vmax.xlane.f32.xlu1 %v334_v46  ;;  %v406_v0 = vsel %vm2579_vm8, %v405_v60, -inf  ;;  %vm1918_vm1 = vmand %vm436_vm13, %vm437_vm9  ;;  %1466 = vmatprep.subr.bf16.mxu0 %v1658_v18  ;;  %v1473_v34 = vpack.c.bf16 %v465_v33, %v464_v30  ;;  %v1476_v39 = vpack.c.bf16 %v467_v36, %v466_v35  ;;  %v1479_v42 = vpack.c.bf16 %v469_v41, %v468_v40  ;;  %v471_v46 = vld [vmem:[%s2479_s1 + $0x58] sm:$0xff]  ;;  %v553_v60 = vld [vmem:[%s2480_s2 + $0x28] sm:$0xff] }
  0x2f   : > { %v2581_v8 = vsel %vm1918_vm1, 4294967295, %v2580_v8  ;;  %vm1928_vm7 = vmand %vm448_vm12, %vm449_vm0  ;;  %v441_v21 = vsel %vm1918_vm1, %v1709_v4, -inf  ;;  %1468 = vmatpush3.bf16.msra.mxu0 %v1467_v15  ;;  %v1482_v47 = vpack.c.bf16 %v471_v46, %v470_v45  ;;  %vm1659_vm9 = vmmov 0   ;;  %v554_v11 = vld [vmem:[%s2480_s2 + $0x30] sm:$0xff]  ;;  %v561_v41 = vld [vmem:[%s2480_s2 + $0x68] sm:$0xff] }
  0x30   : > { %v2583_v12 = vsel %vm1928_vm7, 4294967295, %v2582_v12  ;;  %vm2584_vm4 = vmmov %vm2579_vm8  ;;  %v453_v22 = vsel %vm1928_vm7, %v1709_v4, -inf  ;;  %1469 = vmatprep.subr.bf16.mxu0 %v1658_v18  ;;  %1463 = vmatprep.mubr.msk.f32.mxu0 %vm1659_vm9, %v2498_v1  ;;  %v579_v59 = vand.u32 4294901760, %v548_v53  ;;  %v591_v24 = vand.u32 4294901760, %v554_v11  ;;  %v558_v35 = vld [vmem:[%s2480_s2 + $0x50] sm:$0xff] }
  0x31   : > { %347 = vmax.xlane.f32.xlu0 %v346_v51  ;;  %v418_v16 = vsel %vm2584_vm4, %v417_v6, -inf  ;;  %vm2585_vm3 = vmmov %vm2584_vm4  ;;  %v549_v51 = vld [vmem:[%s2480_s2 + $0x8] sm:$0xff]  ;;  %v585_v6 = vand.u32 4294901760, %v553_v60  ;;  %vm2592_vm4 = vcmp.lt.s32.totalorder %v1691_v2, 5 }
  0x32   : > { %359 = vmax.xlane.f32.xlu1 %v358_v52  ;;  %v430_v17 = vsel %vm2585_vm3, %v429_v7, -inf  ;;  %vm2586_vm0 = vmmov %vm2585_vm3  ;;  %v551_v52 = vld [vmem:[%s2480_s2 + $0x18] sm:$0xff]  ;;  %v577_v54 = vand.u32 4294901760, %v549_v51  ;;  %v2035_v40 = vsub.f32 %v554_v11, %v591_v24 }
  0x33   : > { %v442_v28 = vsel %vm2586_vm0, %v441_v21, -inf  ;;  %vm2587_vm13 = vmmov %vm2586_vm0  ;;  %1471 = vmatpush3.bf16.msra.mxu0 %v1470_v27  ;;  %v557_v27 = vld [vmem:[%s2480_s2 + $0x48] sm:$0xff] }
  0x34   : > { %v454_v29 = vsel %vm2587_vm13, %v453_v22, -inf  ;;  %1472 = vmatprep.subr.bf16.mxu0 %v1658_v18  ;;  %v2001_v15 = vsub.f32 %v549_v51, %v577_v54  ;;  %v2009_v22 = vsub.f32 %v553_v60, %v585_v6  ;;  %2588 = vst [vmem:[#allocation2_spill] sm:$0xff] %v2035_v40  ;;  %v593_v45 = vand.u32 4294901760, %v557_v27  ;;  %v2049_v51 = vld [vmem:[%s2480_s2 + $0x60] sm:$0xff] }
  0x35   : > { %371 = vmax.xlane.f32.xlu0 %v370_v57  ;;  %v581_v57 = vand.u32 4294901760, %v551_v52 }
  0x36   : > { %383 = vmax.xlane.f32.xlu1 %v382_v58  ;;  %v550_v58 = vld [vmem:[%s2480_s2 + $0x10] sm:$0xff] }
  0x37   : > { %1474 = vmatpush3.bf16.msra.mxu0 %v1473_v34  ;;  %v2026_v34 = vpack.c.bf16 %v581_v57, %v577_v54  ;;  %v599_v54 = vand.u32 4294901760, %v558_v35 }
  0x38   : > { %1475 = vmatprep.subr.bf16.mxu0 %v1658_v18 }
  0x39   : > { %395 = vmax.xlane.f32.xlu0 %v394_v63  ;;  %v555_v63 = vld [vmem:[%s2480_s2 + $0x38] sm:$0xff]  ;;  %v2073_v11 = vsub.f32 %v558_v35, %v599_v54 }
  0x3a   : > { %407 = vmax.xlane.f32.xlu1 %v406_v0  ;;  %v583_v0 = vand.u32 4294901760, %v550_v58  ;;  %v589_v7 = vand.u32 4294901760, %v555_v63 }
  0x3b   : > { %1477 = vmatpush3.bf16.msra.mxu0 %v1476_v39 }
  0x3c   : > { %1478 = vmatprep.subr.bf16.mxu0 %v1658_v18  ;;  %v2007_v21 = vsub.f32 %v550_v58, %v583_v0  ;;  %v2011_v23 = vsub.f32 %v555_v63, %v589_v7 }
  0x3d   : > { %419 = vmax.xlane.f32.xlu0 %v418_v16  ;;  %v2003_v16 = vsub.f32 %v551_v52, %v581_v57  ;;  %v2054_v52 = vld [vmem:[%s2480_s2 + $0x70] sm:$0xff]  ;;  %v2058_v57 = vpack.c.bf16 %v589_v7, %v585_v6  ;;  %v2502_v6 = vand.u32 4294901760, %v2049_v51 }
  0x3e   : > { %431 = vmax.xlane.f32.xlu1 %v430_v17  ;;  %v2005_v17 = vsub.f32 %v548_v53, %v579_v59  ;;  %v1536_v39 = vpack.c.bf16 %v2011_v23, %v2009_v22 }
  0x3f   : > { %1480 = vmatpush3.bf16.msra.mxu0 %v1479_v42  ;;  %v1532_v30 = vpack.c.bf16 %v2003_v16, %v2001_v15  ;;  %v2041_v42 = vpack.c.bf16 %v583_v0, %v579_v59  ;;  %v2062_v59 = vsub.f32 %v557_v27, %v593_v45  ;;  %v601_v0 = vand.u32 4294901760, %v561_v41  ;;  %v2090_v27 = vld [vmem:[%s2480_s2 + $0x90] sm:$0xff] }
  0x40   : > { %1481 = vmatprep.subr.bf16.mxu0 %v1658_v18  ;;  %v587_v18 = vand.u32 4294901760, %v552_v10  ;;  %v1534_v36 = vpack.c.bf16 %v2007_v21, %v2005_v17  ;;  %v2107_v7 = vsub.f32 %v2049_v51, %v2502_v6 }
  0x41   : > { %443 = vmax.xlane.f32.xlu0 %v442_v28  ;;  %v559_v28 = vld [vmem:[%s2480_s2 + $0x58] sm:$0xff]  ;;  %1533 = vmatprep.subr.bf16.mxu1 %v1532_v30 }
  0x42   : > { %455 = vmax.xlane.f32.xlu1 %v454_v29  ;;  %v556_v29 = vld [vmem:[%s2480_s2 + $0x40] sm:$0xff]  ;;  %v2024_v33 = vsub.f32 %v552_v10, %v587_v18  ;;  %v597_v46 = vand.u32 4294901760, %v559_v28  ;;  %1535 = vmatpush1.bf16.msra.mxu1 %v1534_v36  ;;  %v2060_v58 = vpack.c.bf16 %v591_v24, %v587_v18  ;;  %v2071_v10 = vld [vmem:[%s2480_s2 + $0x88] sm:$0xff]  ;;  %v2080_v18 = vld [vmem:[%s2480_s2 + $0x98] sm:$0xff] }
  0x43   : > { %1483 = vmatpush3.bf16.msra.mxu0 %v1482_v47  ;;  %v595_v47 = vand.u32 4294901760, %v556_v29  ;;  %1537 = vmatprep.subr.bf16.mxu1 %v1536_v39  ;;  %v2085_v24 = vld [vmem:[%s2480_s2 + $0x80] sm:$0xff] }
  0x44   : > { %1461 = vmatprep.subr.mxu0 %v2498_v1  ;;  %v1538_v53 = vpack.c.bf16 %v2035_v40, %v2024_v33  ;;  %v2064_v60 = vsub.f32 %v559_v28, %v597_v46  ;;  %v2096_v35 = vpack.c.bf16 %v597_v46, %v593_v45  ;;  %v2589_v40 = vand.u32 4294901760, %v2054_v52 }
  0x45   : > { %v2066_v63 = vsub.f32 %v556_v29, %v595_v47  ;;  %v2094_v29 = vsub.f32 %v561_v41, %v601_v0  ;;  %v2098_v36 = vpack.c.bf16 %v599_v54, %v595_v47  ;;  %v2503_v45 = vand.u32 4294901760, %v2071_v10 }
  0x46   : > { %v1540_v28 = vpack.c.bf16 %v2064_v60, %v2062_v59  ;;  %1539 = vmatpush1.bf16.msra.mxu1 %v1538_v53  ;;  %v2112_v41 = vsub.f32 %v2054_v52, %v2589_v40  ;;  %v2504_v46 = vand.u32 4294901760, %v2080_v18  ;;  %v2509_v47 = vand.u32 4294901760, %v2085_v24 }
  0x47   : > { %1462 = vmatpush3.msra.mxu0 %v472_v48  ;;  %v563_v48 = vld [vmem:[%s2480_s2 + $0x78] sm:$0xff]  ;;  %v1542_v39 = vpack.c.bf16 %v2073_v11, %v2066_v63  ;;  %v2125_v6 = vsub.f32 %v2071_v10, %v2503_v45 }
  0x48   : > { %1485 = vmatprep.subr.bf16.mxu0 %v2026_v34  ;;  %v605_v30 = vand.u32 4294901760, %v563_v48  ;;  %2590 = vst [vmem:[#allocation3_spill] sm:$0xff] %v2112_v41  ;;  %1541 = vmatprep.subr.bf16.mxu1 %v1540_v28  ;;  %v2130_v40 = vsub.f32 %v2080_v18, %v2504_v46  ;;  %v1546_v28 = vpack.c.bf16 %v2112_v41, %v2107_v7 }
  0x4a   : > { %v2102_v1 = vsub.f32 %v563_v48, %v605_v30  ;;  %v2120_v54 = vpack.c.bf16 %v605_v30, %v601_v0  ;;  %1543 = vmatpush1.bf16.msra.mxu1 %v1542_v39  ;;  %v2137_v48 = vsub.f32 %v2085_v24, %v2509_v47  ;;  %v2591_v0 = vand.u32 4294901760, %v2090_v27 }
  0x4b   : > { %v1548_v45 = vpack.c.bf16 %v2130_v40, %v2125_v6 }
  0x4c   : > { %v1544_v53 = vpack.c.bf16 %v2102_v1, %v2094_v29  ;;  %v2142_v30 = vsub.f32 %v2090_v27, %v2591_v0 }
  0x4e   : > { %1545 = vmatprep.subr.bf16.mxu1 %v1544_v53  ;;  %v1550_v39 = vpack.c.bf16 %v2142_v30, %v2137_v48 }
  0x4f   : > { %1547 = vmatpush1.bf16.msra.mxu1 %v1546_v28 }
  0x50   : > { %1549 = vmatprep.subr.bf16.mxu1 %v1548_v45  ;;  %v2593_v45 = vmov 0.0  }
  0x53   : > { %1551 = vmatpush1.bf16.msra.mxu1 %v1550_v39 }
  0xa2   : > { %v180_v46 = vpop.xlane.xlu0 %179 }
  0xa3   : > { %v204_v41 = vpop.xlane.xlu1 %203  ;;  %vm181_vm12 = vcmp.eq.f32.partialorder %v1709_v4, %v180_v46 }
  0xa4   : > { %vm205_vm8 = vcmp.eq.f32.partialorder %v1709_v4, %v204_v41  ;;  %vm182_vm3 = vmand %vm2592_vm4, %vm181_vm12  ;;  %vm2594_vm4 = vnez %v2533_v14 }
  0xa5   : > { %vm206_vm0 = vmand %vm1701_vm5, %vm205_vm8  ;;  %v183_v28 = vsel %vm182_vm3, 1.0, %v2593_v45 }
  0xa6   : > { %v192_v0 = vpop.xlane.xlu0 %191 }
  0xa7   : > { %v216_v53 = vpop.xlane.xlu1 %215  ;;  %vm193_vm13 = vcmp.eq.f32.partialorder %v1709_v4, %v192_v0 }
  0xa8   : > { %vm217_vm9 = vcmp.eq.f32.partialorder %v1709_v4, %v216_v53  ;;  %vm194_vm7 = vmand %vm1711_vm10, %vm193_vm13 }
  0xa9   : > { %v195_v46 = vsel %vm194_vm7, 1.0, %v183_v28  ;;  %vm218_vm1 = vmand %vm1727_vm14, %vm217_vm9 }
  0xaa   : > { %v207_v2 = vsel %vm206_vm0, 1.0, %v195_v46  ;;  %v228_v41 = vpop.xlane.xlu0 %227  ;;  %vm2596_vm0 = vnez %v2537_v20 }
  0xab   : > { %v240_v39 = vpop.xlane.xlu1 %239  ;;  %v219_v47 = vsel %vm218_vm1, 1.0, %v207_v2  ;;  %vm229_vm12 = vcmp.eq.f32.partialorder %v1709_v4, %v228_v41  ;;  %vm2595_vm1 = vnez %v2535_v19 }
  0xac   : > { %vm241_vm5 = vcmp.eq.f32.partialorder %v1709_v4, %v240_v39  ;;  %vm230_vm8 = vmand %vm1737_vm2, %vm229_vm12  ;;  %vm2597_vm12 = vnez %v2539_v25 }
  0xad   : > { %v231_v3 = vsel %vm230_vm8, 1.0, %v219_v47  ;;  %vm242_vm3 = vmand %vm2594_vm4, %vm241_vm5  ;;  %vm2598_vm8 = vnez %v2541_v26 }
  0xae   : > { %v252_v5 = vpop.xlane.xlu0 %251  ;;  %v243_v9 = vsel %vm242_vm3, 1.0, %v231_v3 }
  0xaf   : > { %v264_v0 = vpop.xlane.xlu1 %263  ;;  %vm253_vm10 = vcmp.eq.f32.partialorder %v1709_v4, %v252_v5 }
  0xb0   : > { %vm265_vm14 = vcmp.eq.f32.partialorder %v1709_v4, %v264_v0  ;;  %vm254_vm7 = vmand %vm2595_vm1, %vm253_vm10 }
  0xb1   : > { %v255_v53 = vsel %vm254_vm7, 1.0, %v243_v9  ;;  %vm266_vm13 = vmand %vm2596_vm0, %vm265_vm14  ;;  %vm2599_vm14 = vnez %v2545_v31  ;;  %vm2600_vm7 = vnez %v2547_v32 }
  0xb2   : > { %v276_v13 = vpop.xlane.xlu0 %275  ;;  %v267_v14 = vsel %vm266_vm13, 1.0, %v255_v53 }
  0xb3   : > { %v288_v28 = vpop.xlane.xlu1 %287  ;;  %vm277_vm2 = vcmp.eq.f32.partialorder %v1709_v4, %v276_v13 }
  0xb4   : > { %vm289_vm9 = vcmp.eq.f32.partialorder %v1709_v4, %v288_v28  ;;  %vm278_vm5 = vmand %vm2597_vm12, %vm277_vm2 }
  0xb5   : > { %v279_v47 = vsel %vm278_vm5, 1.0, %v267_v14  ;;  %vm290_vm4 = vmand %vm2598_vm8, %vm289_vm9  ;;  %vm2601_vm9 = vnez %v2551_v37  ;;  %vm2602_vm5 = vnez %v2553_v38 }
  0xb6   : > { %v300_v19 = vpop.xlane.xlu0 %299  ;;  %v291_v20 = vsel %vm290_vm4, 1.0, %v279_v47 }
  0xb7   : > { %v312_v46 = vpop.xlane.xlu1 %311  ;;  %vm301_vm3 = vcmp.eq.f32.partialorder %v1709_v4, %v300_v19 }
  0xb8   : > { %vm313_vm10 = vcmp.eq.f32.partialorder %v1709_v4, %v312_v46  ;;  %vm302_vm1 = vmand %vm2599_vm14, %vm301_vm3  ;;  %v568_v46 = vld [vmem:[%s2480_s2 + $0xa0] sm:$0xff] }
  0xb9   : > { %v303_v2 = vsel %vm302_vm1, 1.0, %v291_v20  ;;  %vm314_vm0 = vmand %vm2600_vm7, %vm313_vm10  ;;  %vm2603_vm10 = vnez %v2557_v43  ;;  %vm2604_vm1 = vnez %v2559_v44  ;;  %v570_v20 = vld [vmem:[%s2480_s2 + $0xb0] sm:$0xff] }
  0xba   : > { %v324_v25 = vpop.xlane.xlu0 %323  ;;  %v315_v26 = vsel %vm314_vm0, 1.0, %v303_v2  ;;  %v619_v2 = vand.u32 4294901760, %v568_v46 }
  0xbb   : > { %v336_v41 = vpop.xlane.xlu1 %335  ;;  %vm325_vm13 = vcmp.eq.f32.partialorder %v1709_v4, %v324_v25  ;;  %v623_v25 = vand.u32 4294901760, %v570_v20 }
  0xbc   : > { %vm337_vm2 = vcmp.eq.f32.partialorder %v1709_v4, %v336_v41  ;;  %vm326_vm12 = vmand %vm2601_vm9, %vm325_vm13 }
  0xbd   : > { %v327_v39 = vsel %vm326_vm12, 1.0, %v315_v26  ;;  %vm338_vm8 = vmand %vm2602_vm5, %vm337_vm2  ;;  %vm2605_vm2 = vnez %v2563_v49  ;;  %vm2606_vm12 = vnez %v2565_v50 }
  0xbe   : > { %v348_v31 = vpop.xlane.xlu0 %347  ;;  %v339_v32 = vsel %vm338_vm8, 1.0, %v327_v39  ;;  %v2611_v39 = vand.u32 4294901760, %v2049_v51 }
  0xbf   : > { %v360_v3 = vpop.xlane.xlu1 %359  ;;  %vm349_vm4 = vcmp.eq.f32.partialorder %v1709_v4, %v348_v31  ;;  %v2612_v31 = vand.u32 4294901760, %v2054_v52 }
  0xc0   : > { %vm361_vm3 = vcmp.eq.f32.partialorder %v1709_v4, %v360_v3  ;;  %vm350_vm14 = vmand %vm2603_vm10, %vm349_vm4 }
  0xc1   : > { %v351_v5 = vsel %vm350_vm14, 1.0, %v339_v32  ;;  %vm362_vm7 = vmand %vm2604_vm1, %vm361_vm3  ;;  %vm2607_vm3 = vnez %v2569_v55  ;;  %v2248_v3 = vpack.c.bf16 %v2612_v31, %v2611_v39  ;;  %v806_v32 = vsub.f32 %v568_v46, %v619_v2 }
  0xc2   : > { %v372_v37 = vpop.xlane.xlu0 %371  ;;  %v363_v38 = vsel %vm362_vm7, 1.0, %v351_v5  ;;  %v818_v5 = vsub.f32 %v570_v20, %v623_v25 }
  0xc3   : > { %v384_v0 = vpop.xlane.xlu1 %383  ;;  %vm373_vm0 = vcmp.eq.f32.partialorder %v1709_v4, %v372_v37 }
  0xc4   : > { %vm385_vm13 = vcmp.eq.f32.partialorder %v1709_v4, %v384_v0  ;;  %vm374_vm9 = vmand %vm2605_vm2, %vm373_vm0  ;;  %v1554_v0 = vpack.c.bf16 %v818_v5, %v806_v32  ;;  %v819_v46 = vand.u32 4294901760, %v818_v5 }
  0xc5   : > { %v375_v9 = vsel %vm374_vm9, 1.0, %v363_v38  ;;  %vm386_vm5 = vmand %vm2606_vm12, %vm385_vm13  ;;  %vm2608_vm9 = vnez %v2581_v8  ;;  %v573_v38 = vld [vmem:[%s2480_s2 + $0xc8] sm:$0xff] }
  0xc6   : > { %v396_v43 = vpop.xlane.xlu0 %395  ;;  %v387_v44 = vsel %vm386_vm5, 1.0, %v375_v9  ;;  %vm2609_vm5 = vnez %v2583_v12  ;;  %v621_v12 = vand.u32 4294901760, %v571_v62  ;;  %v2613_v9 = vand.u32 4294901760, %v2071_v10 }
  0xc7   : > { %v408_v53 = vpop.xlane.xlu1 %407  ;;  %vm397_vm8 = vcmp.eq.f32.partialorder %v1709_v4, %v396_v43  ;;  %v2614_v43 = vand.u32 4294901760, %v2080_v18  ;;  %v2260_v52 = vand.u32 4294901760, %v573_v38  ;;  %v820_v39 = vsub.f32 %v818_v5, %v819_v46 }
  0xc8   : > { %vm409_vm4 = vcmp.eq.f32.partialorder %v1709_v4, %v408_v53  ;;  %vm398_vm10 = vmand %vm2607_vm3, %vm397_vm8  ;;  %v812_v26 = vsub.f32 %v571_v62, %v621_v12  ;;  %v572_v53 = vld [vmem:[%s2480_s2 + $0xc0] sm:$0xff] }
  0xc9   : > { %v399_v13 = vsel %vm398_vm10, 1.0, %v387_v44  ;;  %vm410_vm14 = vmand %vm1882_vm11, %vm409_vm4  ;;  %v2258_v51 = vpack.c.bf16 %v2614_v43, %v2613_v9  ;;  %v2615_v44 = vand.u32 4294901760, %v2085_v24  ;;  %v2275_v10 = vsub.f32 %v573_v38, %v2260_v52 }
  0xca   : > { %v420_v49 = vpop.xlane.xlu0 %419  ;;  %v411_v50 = vsel %vm410_vm14, 1.0, %v399_v13  ;;  %v2616_v13 = vand.u32 4294901760, %v2090_v27  ;;  %v2285_v24 = vpack.c.bf16 %v623_v25, %v619_v2  ;;  %v681_v27 = vand.u32 4294901760, %v2001_v15 }
  0xcb   : > { %v432_v28 = vpop.xlane.xlu1 %431  ;;  %vm421_vm1 = vcmp.eq.f32.partialorder %v1709_v4, %v420_v49 }
  0xcc   : > { %vm433_vm7 = vcmp.eq.f32.partialorder %v1709_v4, %v432_v28  ;;  %vm422_vm0 = vmand %vm1898_vm15, %vm421_vm1  ;;  %vm2610_vm15 = vcmask 850944   ;;  %v2269_v49 = vpack.c.bf16 %v2616_v13, %v2615_v44  ;;  %v2271_v28 = vand.u32 4294901760, %v572_v53 }
  0xcd   : > { %v423_v14 = vsel %vm422_vm0, 1.0, %v411_v50  ;;  %vm434_vm13 = vmand %vm1902_vm6, %vm433_vm7  ;;  %v2522_v44 = vand.u32 4294901760, %v2005_v17 }
  0xce   : > { %v444_v55 = vpop.xlane.xlu0 %443  ;;  %v435_v56 = vsel %vm434_vm13, 1.0, %v423_v14  ;;  %v2279_v18 = vsub.f32 %v572_v53, %v2271_v28  ;;  %v693_v14 = vand.u32 4294901760, %v2003_v16  ;;  %vm2618_vm4 = vmmov %vm2610_vm15 }
  0xcf   : > { %v456_v47 = vpop.xlane.xlu1 %455  ;;  %vm445_vm2 = vcmp.eq.f32.partialorder %v1709_v4, %v444_v55  ;;  %v682_v55 = vsub.f32 %v2001_v15, %v681_v27  ;;  %v688_v13 = vsub.f32 %v2005_v17, %v2522_v44  ;;  %v783_v44 = vand.u32 4294901760, %v2137_v48 }
  0xd0   : > { %vm457_vm11 = vcmp.eq.f32.partialorder %v1709_v4, %v456_v47  ;;  %vm446_vm12 = vmand %vm2608_vm9, %vm445_vm2  ;;  %v569_v4 = vld [vmem:[%s2480_s2 + $0xa8] sm:$0xff]  ;;  %v694_v47 = vsub.f32 %v2003_v16, %v693_v14  ;;  %v821_v16 = vand.u32 4294901760, %v820_v39  ;;  %v2298_v38 = vpack.c.bf16 %v693_v14, %v681_v27 }
  0xd1   : > { %v447_v19 = vsel %vm446_vm12, 1.0, %v435_v56  ;;  %vm458_vm8 = vmand %vm2609_vm5, %vm457_vm11  ;;  %v617_v8 = vand.u32 4294901760, %v569_v4  ;;  %v683_v56 = vand.u32 4294901760, %v682_v55  ;;  %v2512_v55 = vand.u32 4294901760, %v2024_v33 }
  0xd2   : > { %v2221_v61 = vsel %vm458_vm8, 1.0, %v447_v19  ;;  %v695_v19 = vand.u32 4294901760, %v694_v47  ;;  %v2617_v47 = vld [vmem:[#allocation2_spill] sm:$0xff] }
  0xd3   : > { %1464 = vmatmul.mubr.msk.f32.vlgmr.msra.gmra.mrb[0].mxu0 %vm2610_vm15, %v2221_v61  ;;  %v800_v41 = vsub.f32 %v569_v4, %v617_v8  ;;  %v2282_v50 = vpack.c.bf16 %v621_v12, %v617_v8  ;;  %v813_v8 = vand.u32 4294901760, %v812_v26  ;;  %v807_v12 = vand.u32 4294901760, %v806_v32 }
  0xd4   : > { %1487 = vmatpush1.bf16.msra.mxu0 %v2041_v42  ;;  %667 = vmatprep.mubr.f32.mxu0 %v2593_v45  ;;  %v1508_v4 = vpack.c.bf16 %v695_v19, %v683_v56  ;;  %v2510_v56 = vand.u32 4294901760, %v2617_v47 }
  0xd5   : > { %1489 = vmatprep.subr.bf16.mxu0 %v2058_v57  ;;  %v1552_v37 = vpack.c.bf16 %v812_v26, %v800_v41  ;;  %v801_v62 = vand.u32 4294901760, %v800_v41  ;;  %v814_v2 = vsub.f32 %v812_v26, %v813_v8  ;;  %v808_v25 = vsub.f32 %v806_v32, %v807_v12 }
  0xd6   : > { %v2304_v53 = vpack.c.bf16 %v819_v46, %v807_v12  ;;  %v2516_v26 = vand.u32 4294901760, %v2009_v22  ;;  %v2514_v32 = vand.u32 4294901760, %v2011_v23  ;;  %v724_v39 = vsub.f32 %v2617_v47, %v2510_v56 }
  0xd7   : > { %1553 = vmatprep.subr.bf16.mxu1 %v1552_v37  ;;  %v802_v20 = vsub.f32 %v800_v41, %v801_v62  ;;  %v815_v15 = vand.u32 4294901760, %v814_v2  ;;  %v809_v37 = vand.u32 4294901760, %v808_v25  ;;  %v2302_v43 = vpack.c.bf16 %v813_v8, %v801_v62 }
  0xd8   : > { %1491 = vmatpush1.bf16.msra.mxu0 %v2060_v58  ;;  %1555 = vmatpush1.bf16.msra.mxu1 %v1554_v0  ;;  %v2517_v41 = vand.u32 4294901760, %v2007_v21  ;;  %v2513_v62 = vand.u32 4294901760, %v2064_v60  ;;  %v706_v12 = vsub.f32 %v2009_v22, %v2516_v26  ;;  %v718_v46 = vsub.f32 %v2011_v23, %v2514_v32 }
  0xd9   : > { %1493 = vmatprep.subr.bf16.mxu0 %v2096_v35  ;;  %955 = vmatprep.subr.mxu1 %v2275_v10  ;;  %v803_v31 = vand.u32 4294901760, %v802_v20  ;;  %v2300_v9 = vpack.c.bf16 %v821_v16, %v809_v37  ;;  %v689_v2 = vand.u32 4294901760, %v688_v13 }
  0xda   : > { %v700_v14 = vsub.f32 %v2007_v21, %v2517_v41  ;;  %v742_v16 = vsub.f32 %v2064_v60, %v2513_v62  ;;  %v707_v13 = vand.u32 4294901760, %v706_v12 }
  0xdb   : > { %v2296_v0 = vpack.c.bf16 %v815_v15, %v803_v31  ;;  %v2515_v31 = vand.u32 4294901760, %v2066_v63 }
  0xdc   : > { %1495 = vmatpush1.bf16.msra.mxu0 %v2098_v36  ;;  %958 = vmatpush1.msra.mxu1 %v2279_v18  ;;  %v701_v25 = vand.u32 4294901760, %v700_v14  ;;  %v2519_v14 = vand.u32 4294901760, %v2094_v29  ;;  %v743_v32 = vand.u32 4294901760, %v742_v16  ;;  %v795_v16 = vand.u32 4294901760, %v2142_v30 }
  0xdd   : > { %1497 = vmatprep.subr.bf16.mxu0 %v2120_v54  ;;  %1557 = vmatprep.subr.bf16.mxu1 %v2026_v34  ;;  %v736_v62 = vsub.f32 %v2066_v63, %v2515_v31  ;;  %v2619_v31 = vld [vmem:[#allocation3_spill] sm:$0xff] }
  0xde   : > { %v1510_v56 = vpack.c.bf16 %v701_v25, %v689_v2  ;;  %v771_v26 = vand.u32 4294901760, %v2619_v31 }
  0xe0   : > { %1499 = vmatpush1.bf16.msra.mxu0 %v2248_v3 }
  0xe1   : > { %1501 = vmatprep.subr.bf16.mxu0 %v2258_v51 }
  0xe4   : > { %1503 = vmatpush1.bf16.msra.mxu0 %v2269_v49 }
  0xe5   : > { %1505 = vmatprep.subr.bf16.mxu0 %v2282_v50 }
  0xe8   : > { %1507 = vmatpush1.bf16.msra.mxu0 %v2285_v24 }
  0xe9   : > { %626 = vmatprep.subr.mxu0 %v2260_v52 }
  0xec   : > { %628 = vmatpush1.msra.mxu0 %v2271_v28 }
  0xed   : > { %1509 = vmatprep.subr.bf16.mxu0 %v1508_v4  ;;  %v2511_v4 = vand.u32 4294901760, %v2062_v59 }
  0xef   : > { %v730_v37 = vsub.f32 %v2062_v59, %v2511_v4 }
 0x1a6   : > { %v542_v5 = vpop.f32.mrb[0].mxu0 }
 0x1a7   : > { %vm546_vm6 = vcmp.eq.f32.partialorder %v542_v5, 1.0  ;;  %v1465_v27 = vpop.f32.mrb[1].mxu0  ;;  %v2520_v5 = vand.u32 4294901760, %v2073_v11 }
 0x1a8   : > { %v547_v19 = vsel %vm546_vm6, %v2221_v61, 0.0  ;;  %v712_v61 = vsub.f32 %v2024_v33, %v2512_v55  ;;  %v719_v27 = vand.u32 4294901760, %v718_v46  ;;  %v725_v55 = vand.u32 4294901760, %v724_v39 }
 0x1a9   : > { %v575_v8 = vsel %vm2618_vm4, %v547_v19, 0  ;;  %v731_v46 = vand.u32 4294901760, %v730_v37  ;;  %v748_v2 = vsub.f32 %v2073_v11, %v2520_v5  ;;  %v759_v39 = vand.u32 4294901760, %v2107_v7 }
 0x1aa   : > { %v2328_v20 = vand.u32 4294901760, %v575_v8  ;;  %v713_v4 = vand.u32 4294901760, %v712_v61  ;;  %v1512_v25 = vpack.c.bf16 %v719_v27, %v707_v13  ;;  %v754_v61 = vsub.f32 %v2094_v29, %v2519_v14 }
 0x1ab   : > { %v2523_v37 = vand.u32 4294901760, %v2125_v6  ;;  %v1516_v27 = vpack.c.bf16 %v743_v32, %v731_v46  ;;  %v737_v14 = vand.u32 4294901760, %v736_v62  ;;  %v749_v5 = vand.u32 4294901760, %v748_v2 }
 0x1ac   : > { %v2338_v15 = vsub.f32 %v575_v8, %v2328_v20  ;;  %v2521_v8 = vand.u32 4294901760, %v2102_v1  ;;  %v1514_v13 = vpack.c.bf16 %v725_v55, %v713_v4 }
 0x1ad   : > { %v778_v55 = vsub.f32 %v2125_v6, %v2523_v37  ;;  %v1518_v62 = vpack.c.bf16 %v749_v5, %v737_v14 }
 0x1ae   : > { %v2518_v19 = vand.u32 4294901760, %v2338_v15  ;;  %1000 = vmatmul.mubr.f32.vlgmr.msra.gmra.mrb[0].mxu1 %v2338_v15 }
 0x1af   : > { %1559 = vmatpush1.bf16.msra.mxu1 %v2041_v42  ;;  %1096 = vmatprep.mubr.f32.mxu1 %v2593_v45  ;;  %v779_v37 = vand.u32 4294901760, %v778_v55  ;;  %v2622_v55 = vand.u32 4294901760, %v2007_v21  ;;  %v2626_v21 = vand.u32 4294901760, %v2024_v33  ;;  %v2632_v33 = vand.u32 4294901760, %v2094_v29 }
 0x1b0   : > { %1561 = vmatprep.subr.bf16.mxu1 %v2058_v57  ;;  %v671_v12 = vsub.f32 %v2338_v15, %v2518_v19  ;;  %v766_v19 = vsub.f32 %v2102_v1, %v2521_v8  ;;  %v772_v8 = vsub.f32 %v2619_v31, %v771_v26  ;;  %v1598_v29 = vpack.c.bf16 %v795_v16, %v783_v44 }
 0x1b2   : > { %v672_v41 = vand.u32 4294901760, %v671_v12  ;;  %v760_v12 = vsub.f32 %v2107_v7, %v759_v39  ;;  %v767_v32 = vand.u32 4294901760, %v766_v19  ;;  %v773_v2 = vand.u32 4294901760, %v772_v8 }
 0x1b3   : > { %1563 = vmatpush1.bf16.msra.mxu1 %v2060_v58  ;;  %v784_v19 = vsub.f32 %v2137_v48, %v783_v44 }
 0x1b4   : > { %673 = vmatmul.mubr.f32.vlgmr.msra.gmra.mrb[2].mxu0 %v672_v41  ;;  %1565 = vmatprep.subr.bf16.mxu1 %v2096_v35  ;;  %v755_v41 = vand.u32 4294901760, %v754_v61  ;;  %v761_v46 = vand.u32 4294901760, %v760_v12  ;;  %v825_v12 = vand.u32 4294901760, %v2275_v10 }
 0x1b5   : > { %1511 = vmatpush1.bf16.msra.mxu0 %v1510_v56  ;;  %873 = vmatprep.mubr.f32.mxu0 %v2593_v45  ;;  %v2620_v56 = vand.u32 4294901760, %v2130_v40  ;;  %v785_v14 = vand.u32 4294901760, %v784_v19  ;;  %v2624_v19 = vand.u32 4294901760, %v2011_v23  ;;  %v2629_v23 = vand.u32 4294901760, %v2064_v60 }
 0x1b6   : > { %1513 = vmatprep.subr.bf16.mxu0 %v1512_v25  ;;  %v796_v25 = vsub.f32 %v2142_v30, %v795_v16  ;;  %v1520_v61 = vpack.c.bf16 %v767_v32, %v755_v41  ;;  %v1522_v5 = vpack.c.bf16 %v773_v2, %v761_v46  ;;  %v826_v32 = vsub.f32 %v2275_v10, %v825_v12 }
 0x1b7   : > { %v790_v4 = vsub.f32 %v2130_v40, %v2620_v56  ;;  %1567 = vmatpush1.bf16.msra.mxu1 %v2098_v36  ;;  %v2623_v2 = vand.u32 4294901760, %v2009_v22  ;;  %v2628_v22 = vand.u32 4294901760, %v2062_v59  ;;  %v1594_v60 = vpack.c.bf16 %v771_v26, %v759_v39 }
 0x1b8   : > { %1569 = vmatprep.subr.bf16.mxu1 %v2120_v54  ;;  %v797_v8 = vand.u32 4294901760, %v796_v25  ;;  %v827_v46 = vand.u32 4294901760, %v826_v32  ;;  %v2625_v25 = vand.u32 4294901760, %v2338_v15 }
 0x1b9   : > { %1515 = vmatpush1.bf16.msra.mxu0 %v1514_v13  ;;  %v791_v56 = vand.u32 4294901760, %v790_v4  ;;  %v1584_v10 = vpack.c.bf16 %v2624_v19, %v2623_v2 }
 0x1ba   : > { %1517 = vmatprep.subr.bf16.mxu0 %v1516_v27  ;;  %v831_v27 = vand.u32 4294901760, %v2279_v18  ;;  %v1526_v41 = vpack.c.bf16 %v797_v8, %v785_v14 }
 0x1bb   : > { %1571 = vmatpush1.bf16.msra.mxu1 %v2248_v3  ;;  %v1524_v13 = vpack.c.bf16 %v791_v56, %v779_v37  ;;  %v2621_v37 = vand.u32 4294901760, %v2005_v17 }
 0x1bc   : > { %1573 = vmatprep.subr.bf16.mxu1 %v2258_v51 }
 0x1bd   : > { %1519 = vmatpush1.bf16.msra.mxu0 %v1518_v62  ;;  %v1582_v4 = vpack.c.bf16 %v2622_v55, %v2621_v37  ;;  %v832_v62 = vsub.f32 %v2279_v18, %v831_v27  ;;  %v2627_v18 = vand.u32 4294901760, %v2617_v47  ;;  %v2633_v47 = vand.u32 4294901760, %v2102_v1 }
 0x1be   : > { %1521 = vmatprep.subr.bf16.mxu0 %v1520_v61  ;;  %v1588_v61 = vpack.c.bf16 %v2629_v23, %v2628_v22 }
 0x1bf   : > { %1575 = vmatpush1.bf16.msra.mxu1 %v2269_v49  ;;  %v833_v17 = vand.u32 4294901760, %v832_v62  ;;  %v1592_v59 = vpack.c.bf16 %v2633_v47, %v2632_v33 }
 0x1c0   : > { %1577 = vmatprep.subr.bf16.mxu1 %v2282_v50 }
 0x1c1   : > { %1523 = vmatpush1.bf16.msra.mxu0 %v1522_v5 }
 0x1c2   : > { %1525 = vmatprep.subr.bf16.mxu0 %v1524_v13 }
 0x1c3   : > { %1579 = vmatpush1.bf16.msra.mxu1 %v2285_v24 }
 0x1c4   : > { %1055 = vmatprep.subr.mxu1 %v2260_v52 }
 0x1c5   : > { %1527 = vmatpush1.bf16.msra.mxu0 %v1526_v41 }
 0x1c6   : > { %1529 = vmatprep.subr.bf16.mxu0 %v2296_v0  ;;  %v1586_v0 = vpack.c.bf16 %v2627_v18, %v2626_v21 }
 0x1c7   : > { %1057 = vmatpush1.msra.mxu1 %v2271_v28 }
 0x1c8   : > { %1100 = vmatmul.mubr.f32.vlgmr.msra.gmra.mrb[0].mxu1 %v2625_v25  ;;  %1581 = vmatprep.subr.bf16.mxu1 %v2298_v38  ;;  %v2630_v38 = vand.u32 4294901760, %v2066_v63  ;;  %v2634_v63 = vand.u32 4294901760, %v2125_v6 }
 0x1c9   : > { %1531 = vmatpush1.bf16.msra.mxu0 %v2300_v9  ;;  %1583 = vmatpush1.bf16.msra.mxu1 %v1582_v4  ;;  %v2631_v9 = vand.u32 4294901760, %v2073_v11  ;;  %v2635_v11 = vand.u32 4294901760, %v2130_v40 }
 0x1ca   : > { %828 = vmatprep.subr.mxu0 %v827_v46  ;;  %1585 = vmatprep.subr.bf16.mxu1 %v1584_v10 }
 0x1cb   : > { %1248 = vmatprep.mubr.f32.mxu1 %v2593_v45  ;;  %v1590_v15 = vpack.c.bf16 %v2631_v9, %v2630_v38  ;;  %v1596_v56 = vpack.c.bf16 %v2635_v11, %v2634_v63 }
 0x1cd   : > { %834 = vmatpush1.msra.mxu0 %v833_v17  ;;  %1587 = vmatpush1.bf16.msra.mxu1 %v1586_v0 }
 0x1ce   : > { %875 = vmatmul.mubr.f32.vlgmr.msra.gmra.mrb[2].mxu0 %v2328_v20  ;;  %1589 = vmatprep.subr.bf16.mxu1 %v1588_v61 }
 0x1d1   : > { %1591 = vmatpush1.bf16.msra.mxu1 %v1590_v15 }
 0x1d2   : > { %1593 = vmatprep.subr.bf16.mxu1 %v1592_v59 }
 0x1d5   : > { %1595 = vmatpush1.bf16.msra.mxu1 %v1594_v60 }
 0x1d6   : > { %1597 = vmatprep.subr.bf16.mxu1 %v1596_v56 }
 0x1d9   : > { %1599 = vmatpush1.bf16.msra.mxu1 %v1598_v29 }
 0x1da   : > { %1601 = vmatprep.subr.bf16.mxu1 %v2302_v43 }
 0x1dd   : > { %1603 = vmatpush1.bf16.msra.mxu1 %v2304_v53 }
 0x1de   : > { %1205 = vmatprep.subr.mxu1 %v825_v12 }
 0x1e1   : > { %1209 = vmatpush1.msra.mxu1 %v831_v27 }
 0x1e2   : > { %1250 = vmatmul.mubr.f32.vlgmr.msra.gmra.mrb[0].mxu1 %v2328_v20  ;;  %1605 = vmatprep.subr.bf16.mxu1 %v2026_v34 }
 0x1e3   : > { %1607 = vmatpush1.bf16.msra.mxu1 %v2041_v42  ;;  %1346 = vmatprep.mubr.f32.mxu1 %v2593_v45 }
 0x1e4   : > { %1609 = vmatprep.subr.bf16.mxu1 %v2058_v57 }
 0x1e7   : > { %1611 = vmatpush1.bf16.msra.mxu1 %v2060_v58 }
 0x1e8   : > { %1613 = vmatprep.subr.bf16.mxu1 %v2096_v35 }
 0x1eb   : > { %1615 = vmatpush1.bf16.msra.mxu1 %v2098_v36 }
 0x1ec   : > { %1617 = vmatprep.subr.bf16.mxu1 %v2120_v54 }
 0x1ef   : > { %1619 = vmatpush1.bf16.msra.mxu1 %v2248_v3 }
 0x1f0   : > { %1621 = vmatprep.subr.bf16.mxu1 %v2258_v51 }
 0x1f3   : > { %1623 = vmatpush1.bf16.msra.mxu1 %v2269_v49 }
 0x1f4   : > { %1625 = vmatprep.subr.bf16.mxu1 %v2282_v50 }
 0x1f7   : > { %1627 = vmatpush1.bf16.msra.mxu1 %v2285_v24 }
 0x1f8   : > { %1305 = vmatprep.subr.mxu1 %v2260_v52 }
 0x1fb   : > { %1307 = vmatpush1.msra.mxu1 %v2271_v28 }
 0x1fc   : > { %1348 = vmatmul.mubr.f32.vlgmr.msra.gmra.mrb[0].mxu1 %v2328_v20 }
 0x2a1   : > { %v876_v1 = vpop.f32.mrb[2].mxu0 }
 0x2a2   : > { %v878_v34 = vpop.f32.mrb[3].mxu0 }
 0x2cf   : > { %v1349_v42 = vpop.f32.mrb[0].mxu1 }
 0x2d0   : > { %v1628_v57 = vadd.f32 %v1349_v42, %v876_v1  ;;  %v1351_v58 = vpop.f32.mrb[1].mxu1 }
 0x2d1   : > { %v1629_v6 = vadd.f32 %v1351_v58, %v878_v34 }
 0x2d2   : > { %1354 = vst [vmem:[%s167_s24] sm:$0xff] %v1628_v57 }
 0x2d3   : > { %1355 = vst [vmem:[%s167_s24 + $0x8] sm:$0xff] %v1629_v6 }
 0x2d4 PF: > { %s13_s12 = sadd.s32 1, %s1655_s12  }
 0x2d5   : > { %p10_p4 = scmp.ge.s32.totalorder %s13_s12, 4  }
 0x2d7   :  { %12 = sbr.rel (!%p10_p4) target bundleno = 1 (0x1), region = 62 }

</bundles_post_ra>
